<compile_context>
chip_gen: v7x
topology: tpu7x:2x2x1
jax: 0.10.0
libtpu: 0.0.40
codegen_flags: <defaults>
</compile_context>

<pallas_src>
import functools

import jax
import jax.numpy as jnp
import numpy as np
from jax.experimental import pallas as pl
from jax.experimental.pallas import tpu as pltpu


# --------------------------- per-generation config ---------------------------


@functools.lru_cache(maxsize=None)
def _device_config():
    """Per-chip tile / VMEM configuration (v5e / v6e / v7x), with safe fallbacks."""
    kind = ""
    try:
        kind = jax.devices()[0].device_kind.lower()
    except Exception:
        pass
    vmem_phys = None
    try:
        vmem_phys = int(pltpu.get_tpu_info().vmem_capacity_bytes)
    except Exception:
        vmem_phys = None
    if vmem_phys is None:
        vmem_phys = 64 * 1024 * 1024                # conservative (v7x-sized)
    big_vmem = vmem_phys >= 96 * 1024 * 1024        # 128 MiB parts (v5e / v6e)
    is_v5e = ("v5 lite" in kind) or ("v5e" in kind) or ("v5lite" in kind)
    return {
        "tm": 256,                                   # token tile for matmuls
        "tn": 512 if (big_vmem and not is_v5e) else 256,
        "tk": 1024 if big_vmem else 512,
        "tq": 128 if is_v5e else 256,                # flash-attn q/kv tile
        # leave headroom below physical VMEM (v7x only has 64 MiB per core)
        "vmem_limit": int(min(100 * 1024 * 1024,
                              max(vmem_phys - 16 * 1024 * 1024,
                                  32 * 1024 * 1024))),
    }


def _tile(dim, target):
    """Largest tile <= target that divides dim (dims assumed padded to nice sizes)."""
    t = max(1, min(dim, target))
    while dim % t:
        t -= 1
    return t


def _cparams(dims, cfg):
    return pltpu.CompilerParams(dimension_semantics=dims,
                                vmem_limit_bytes=cfg["vmem_limit"])


# ----------------------------- Pallas kernels ------------------------------


def rmsnorm_residual_kernel(x_ref, res_ref, w_ref, normed_ref, newres_ref, *, eps):
    # QwenRMSNorm with fused residual add; math in f32, normed output bf16.
    s = x_ref[...].astype(jnp.float32) + res_ref[...].astype(jnp.float32)
    newres_ref[...] = s.astype(newres_ref.dtype)
    var = jnp.mean(s * s, axis=-1, keepdims=True)
    inv = jax.lax.rsqrt(var + eps)
    normed_ref[...] = (s * inv * w_ref[...].astype(jnp.float32)).astype(normed_ref.dtype)


def rmsnorm_kernel(x_ref, w_ref, normed_ref, newres_ref, *, eps):
    # Residual-free variant: no streamed zeros tensor.
    s = x_ref[...].astype(jnp.float32)
    newres_ref[...] = x_ref[...]
    var = jnp.mean(s * s, axis=-1, keepdims=True)
    inv = jax.lax.rsqrt(var + eps)
    normed_ref[...] = (s * inv * w_ref[...].astype(jnp.float32)).astype(normed_ref.dtype)


def matmul_kernel(x_ref, w_ref, o_ref, acc_ref):
    # Tiled matmul: bf16 MXU inputs, f32 accumulation, K innermost.
    k = pl.program_id(2)

    @pl.when(k == 0)
    def _init():
        acc_ref[...] = jnp.zeros(acc_ref.shape, acc_ref.dtype)

    x = x_ref[...]
    w = w_ref[...]
    if x_ref.dtype != jnp.bfloat16:
        x = x.astype(jnp.bfloat16)
    if w_ref.dtype != jnp.bfloat16:
        w = w.astype(jnp.bfloat16)
    acc_ref[...] += jnp.dot(x, w, preferred_element_type=jnp.float32)

    @pl.when(k == pl.num_programs(2) - 1)
    def _fin():
        o_ref[...] = acc_ref[...].astype(o_ref.dtype)


def gate_up_silu_kernel(x_ref, wg_ref, wu_ref, o_ref, accg_ref, accu_ref):
    # Fused [w2 | w1] projection; silu(gate)*up epilogue on resident f32 accs.
    k = pl.program_id(2)

    @pl.when(k == 0)
    def _init():
        accg_ref[...] = jnp.zeros(accg_ref.shape, accg_ref.dtype)
        accu_ref[...] = jnp.zeros(accu_ref.shape, accu_ref.dtype)

    x = x_ref[...]
    if x_ref.dtype != jnp.bfloat16:
        x = x.astype(jnp.bfloat16)
    accg_ref[...] += jnp.dot(x, wg_ref[...], preferred_element_type=jnp.float32)
    accu_ref[...] += jnp.dot(x, wu_ref[...], preferred_element_type=jnp.float32)

    @pl.when(k == pl.num_programs(2) - 1)
    def _fin():
        g = accg_ref[...]
        o_ref[...] = (jax.nn.silu(g) * accu_ref[...]).astype(o_ref.dtype)


def qkv_rope_kernel(x_ref, w_ref, b_ref, cos_ref, sin_ref, o_ref, *,
                    num_heads, head_size, slots_per_tile):
    # Fused c_attn projection (+bias) with RoPE in the epilogue.
    # x is resident over the full K dimension (DMA'd once per token tile);
    # grid axis 1 walks groups of `slots_per_tile` head slots (Q: [0,H),
    # K: [H,2H) -> RoPE, V: [2H,3H) -> bias only).
    j = pl.program_id(1)
    x = x_ref[...]
    if x_ref.dtype != jnp.bfloat16:
        x = x.astype(jnp.bfloat16)
    acc = jnp.dot(x, w_ref[...], preferred_element_type=jnp.float32)
    acc = acc + b_ref[...].astype(jnp.float32)
    cos = cos_ref[...]
    sin = sin_ref[...]          # sin_signed = [-sin, sin]
    half = head_size // 2

    for h in range(slots_per_tile):
        col = slice(h * head_size, (h + 1) * head_size)
        sl = acc[:, col]
        head_slot = slots_per_tile * j + h
        is_qk = head_slot < 2 * num_heads

        @pl.when(is_qk)
        def _rope(sl=sl, col=col):
            # rotate-half via lane slices (x1, x2) -> (x2, x1); sin carries the sign.
            rolled = jnp.concatenate([sl[:, half:], sl[:, :half]], axis=1)
            o_ref[:, col] = (sl * cos + rolled * sin).astype(o_ref.dtype)

        @pl.when(jnp.logical_not(is_qk))
        def _plain(sl=sl, col=col):
            o_ref[:, col] = sl.astype(o_ref.dtype)


def flash_attention_kernel(q_ref, k_ref, v_ref, o_ref, m_sc, l_sc, acc_sc, *, sm_scale):
    # Blocked causal flash attention with online softmax.
    # grid = (head, q_tile, kv_tile); kv innermost ("arbitrary"); m/l/acc are
    # VMEM scratch persisting across kv steps. Fully-masked kv blocks are
    # skipped entirely; interior blocks skip mask construction.
    qi = pl.program_id(1)
    ki = pl.program_id(2)
    tq = q_ref.shape[0]
    tkv = k_ref.shape[0]

    @pl.when(ki == 0)
    def _init():
        m_sc[...] = jnp.full(m_sc.shape, -jnp.inf, m_sc.dtype)
        l_sc[...] = jnp.zeros(l_sc.shape, l_sc.dtype)
        acc_sc[...] = jnp.zeros(acc_sc.shape, acc_sc.dtype)

    def scores():
        s = jax.lax.dot_general(q_ref[...], k_ref[...], (((1,), (1,)), ((), ())),
                                preferred_element_type=jnp.float32)
        return s * sm_scale

    def online_softmax_update(s):
        m_prev = m_sc[...]
        m_new = jnp.maximum(m_prev, jnp.max(s, axis=-1, keepdims=True))
        alpha = jnp.exp(m_prev - m_new)
        p = jnp.exp(s - m_new)
        l_sc[...] = alpha * l_sc[...] + jnp.sum(p, axis=-1, keepdims=True)
        acc_sc[...] = alpha * acc_sc[...] + jax.lax.dot_general(
            p.astype(v_ref.dtype), v_ref[...], (((1,), (0,)), ((), ())),
            preferred_element_type=jnp.float32)
        m_sc[...] = m_new

    below_diag = (ki + 1) * tkv <= qi * tq                    # fully unmasked
    on_diag = jnp.logical_and(ki * tkv < (qi + 1) * tq,
                              jnp.logical_not(below_diag))    # needs causal mask

    @pl.when(below_diag)
    def _interior():
        online_softmax_update(scores())

    @pl.when(on_diag)
    def _diagonal():
        # TODO(synk): single prefill sequence assumed (cu_seqlen_prefill = [0, T]);
        # multi-sequence varlen masking not implemented.
        row = qi * tq + jax.lax.broadcasted_iota(jnp.int32, (tq, tkv), 0)
        col = ki * tkv + jax.lax.broadcasted_iota(jnp.int32, (tq, tkv), 1)
        online_softmax_update(jnp.where(col <= row, scores(), -1e30))

    @pl.when(ki == pl.num_programs(2) - 1)
    def _fin():
        o_ref[...] = (acc_sc[...] / l_sc[...]).astype(o_ref.dtype)


def kv_cache_update_kernel(slots_ref, qkv_ref, kc_in_ref, vc_in_ref,
                           kc_ref, vc_ref, sems, *, proj, window):
    # paged_attn.reshape_and_cache: direct HBM->HBM scatter of the (rotated) K
    # and V rows of the fused qkv activation into the caches at `slots`, with a
    # small window of in-flight DMAs. Caches are updated in place via
    # input_output_aliases, so only num_tokens rows move (once).
    del kc_in_ref, vc_in_ref                  # aliased with kc_ref / vc_ref
    num_tokens = qkv_ref.shape[0]

    def k_copy(t, slot, w):
        return pltpu.make_async_copy(
            qkv_ref.at[pl.ds(t, 1), pl.ds(proj, proj)],
            kc_ref.at[pl.ds(slot, 1)], sems.at[0, w])

    def v_copy(t, slot, w):
        return pltpu.make_async_copy(
            qkv_ref.at[pl.ds(t, 1), pl.ds(2 * proj, proj)],
            vc_ref.at[pl.ds(slot, 1)], sems.at[1, w])

    def body(t, carry):
        w = t % window

        @pl.when(t >= window)
        def _wait_oldest():
            tp = t - window
            sp = slots_ref[tp]
            k_copy(tp, sp, w).wait()
            v_copy(tp, sp, w).wait()

        slot = slots_ref[t]
        k_copy(t, slot, w).start()
        v_copy(t, slot, w).start()
        return carry

    jax.lax.fori_loop(0, num_tokens, body, 0)

    tail = min(num_tokens, window)

    def drain(i, carry):
        t = num_tokens - tail + i
        w = t % window
        s = slots_ref[t]
        k_copy(t, s, w).wait()
        v_copy(t, s, w).wait()
        return carry

    jax.lax.fori_loop(0, tail, drain, 0)


# ------------------------------ thin wrappers -------------------------------


def rmsnorm(x, residual, weight, eps, cfg):
    T, H = x.shape
    tm = _tile(T, cfg["tm"])
    if tm == T and T >= 16:            # >=2 parallel steps (v7x megacore)
        tm = _tile(T, max(8, T // 2))
    grid = (T // tm,)
    row_spec = pl.BlockSpec((tm, H), lambda m: (m, 0))
    w_spec = pl.BlockSpec((1, H), lambda m: (0, 0))
    out_shapes = (jax.ShapeDtypeStruct((T, H), jnp.bfloat16),   # normed (bf16)
                  jax.ShapeDtypeStruct((T, H), x.dtype))        # residual stream
    w2 = weight.reshape(1, H).astype(jnp.float32)
    if residual is None:
        kernel = functools.partial(rmsnorm_kernel, eps=eps)
        in_specs = [row_spec, w_spec]
        args = (x, w2)
    else:
        kernel = functools.partial(rmsnorm_residual_kernel, eps=eps)
        in_specs = [row_spec, row_spec, w_spec]
        args = (x, residual, w2)
    return pl.pallas_call(
        kernel,
        out_shape=out_shapes,
        grid_spec=pltpu.PrefetchScalarGridSpec(
            num_scalar_prefetch=0, grid=grid,
            in_specs=in_specs,
            out_specs=(row_spec, row_spec)),
        compiler_params=_cparams(("parallel",), cfg),
    )(*args)


def linear(x, w, *, cfg, out_dtype=None):
    M, K = x.shape
    _, N = w.shape
    if out_dtype is None:
        out_dtype = x.dtype
    tm, tn, tk = _tile(M, cfg["tm"]), _tile(N, cfg["tn"]), _tile(K, cfg["tk"])
    grid = (M // tm, N // tn, K // tk)
    return pl.pallas_call(
        matmul_kernel,
        out_shape=jax.ShapeDtypeStruct((M, N), out_dtype),
        grid_spec=pltpu.PrefetchScalarGridSpec(
            num_scalar_prefetch=0, grid=grid,
            in_specs=[pl.BlockSpec((tm, tk), lambda m, n, k: (m, k)),
                      pl.BlockSpec((tk, tn), lambda m, n, k: (k, n))],
            out_specs=pl.BlockSpec((tm, tn), lambda m, n, k: (m, n)),
            scratch_shapes=[pltpu.VMEM((tm, tn), jnp.float32)]),
        compiler_params=_cparams(("parallel", "parallel", "arbitrary"), cfg),
    )(x, w)


def gate_up_silu(x, w_gate, w_up, *, cfg):
    M, K = x.shape
    N = w_gate.shape[1]
    tm, tn, tk = _tile(M, cfg["tm"]), _tile(N, cfg["tn"]), _tile(K, cfg["tk"])
    grid = (M // tm, N // tn, K // tk)
    return pl.pallas_call(
        gate_up_silu_kernel,
        out_shape=jax.ShapeDtypeStruct((M, N), jnp.bfloat16),
        grid_spec=pltpu.PrefetchScalarGridSpec(
            num_scalar_prefetch=0, grid=grid,
            in_specs=[pl.BlockSpec((tm, tk), lambda m, n, k: (m, k)),
                      pl.BlockSpec((tk, tn), lambda m, n, k: (k, n)),
                      pl.BlockSpec((tk, tn), lambda m, n, k: (k, n))],
            out_specs=pl.BlockSpec((tm, tn), lambda m, n, k: (m, n)),
            scratch_shapes=[pltpu.VMEM((tm, tn), jnp.float32),
                            pltpu.VMEM((tm, tn), jnp.float32)]),
        compiler_params=_cparams(("parallel", "parallel", "arbitrary"), cfg),
    )(x, w_gate, w_up)


def qkv_rope(x, w, b, cos_full, sin_signed, *, num_heads, head_size, cfg):
    M, K = x.shape
    N = w.shape[1]                           # 3 * num_heads * head_size
    slots_per_tile = 2 if (N // head_size) % 2 == 0 else 1
    tn = slots_per_tile * head_size
    tm = _tile(M, cfg["tm"])
    grid = (M // tm, N // tn)                # x DMA'd once per m tile (n inner)
    return pl.pallas_call(
        functools.partial(qkv_rope_kernel, num_heads=num_heads,
                          head_size=head_size, slots_per_tile=slots_per_tile),
        out_shape=jax.ShapeDtypeStruct((M, N), jnp.bfloat16),
        grid_spec=pltpu.PrefetchScalarGridSpec(
            num_scalar_prefetch=0, grid=grid,
            in_specs=[
                pl.BlockSpec((tm, K), lambda m, j: (m, 0)),           # x (full K)
                pl.BlockSpec((K, tn), lambda m, j: (0, j)),           # W column block
                pl.BlockSpec((1, tn), lambda m, j: (0, j)),           # bias
                pl.BlockSpec((tm, head_size), lambda m, j: (m, 0)),   # cos_full
                pl.BlockSpec((tm, head_size), lambda m, j: (m, 0)),   # sin_signed
            ],
            out_specs=pl.BlockSpec((tm, tn), lambda m, j: (m, j))),
        compiler_params=_cparams(("parallel", "parallel"), cfg),
    )(x, w, b.reshape(1, N), cos_full, sin_signed)


def flash_attention(qkv, *, num_heads, head_size, sm_scale, cfg):
    T = qkv.shape[0]
    proj = num_heads * head_size
    t_att = _tile(T, cfg["tq"])              # tq == tkv (keeps masking safe)
    grid = (num_heads, T // t_att, T // t_att)

    def last_causal_block(qi):
        return ((qi + 1) * t_att - 1) // t_att

    # K/V index maps are clamped to the causal bound: fully-masked kv steps map
    # to the already-resident diagonal block -> no wasted DMA.
    q_spec = pl.BlockSpec((t_att, head_size), lambda h, qi, ki: (qi, h))
    k_spec = pl.BlockSpec(
        (t_att, head_size),
        lambda h, qi, ki: (jnp.minimum(ki, last_causal_block(qi)), num_heads + h))
    v_spec = pl.BlockSpec(
        (t_att, head_size),
        lambda h, qi, ki: (jnp.minimum(ki, last_causal_block(qi)), 2 * num_heads + h))
    o_spec = pl.BlockSpec((t_att, head_size), lambda h, qi, ki: (qi, h))

    return pl.pallas_call(
        functools.partial(flash_attention_kernel, sm_scale=sm_scale),
        out_shape=jax.ShapeDtypeStruct((T, proj), jnp.bfloat16),
        grid_spec=pltpu.PrefetchScalarGridSpec(
            num_scalar_prefetch=0, grid=grid,
            in_specs=[q_spec, k_spec, v_spec],
            out_specs=o_spec,
            scratch_shapes=[pltpu.VMEM((t_att, 1), jnp.float32),
                            pltpu.VMEM((t_att, 1), jnp.float32),
                            pltpu.VMEM((t_att, head_size), jnp.float32)]),
        compiler_params=_cparams(("parallel", "parallel", "arbitrary"), cfg),
    )(qkv, qkv, qkv)


def kv_cache_update(qkv, k_cache, v_cache, slots, *, proj, cfg, window=8):
    assert qkv.dtype == k_cache.dtype == v_cache.dtype
    return pl.pallas_call(
        functools.partial(kv_cache_update_kernel, proj=proj, window=window),
        out_shape=(jax.ShapeDtypeStruct(k_cache.shape, k_cache.dtype),
                   jax.ShapeDtypeStruct(v_cache.shape, v_cache.dtype)),
        in_specs=[
            pl.BlockSpec(memory_space=pltpu.MemorySpace.SMEM),   # slots
            pl.BlockSpec(memory_space=pl.ANY),                   # qkv (HBM)
            pl.BlockSpec(memory_space=pl.ANY),                   # k_cache (aliased)
            pl.BlockSpec(memory_space=pl.ANY),                   # v_cache (aliased)
        ],
        out_specs=(pl.BlockSpec(memory_space=pl.ANY),
                   pl.BlockSpec(memory_space=pl.ANY)),
        scratch_shapes=[pltpu.SemaphoreType.DMA((2, window))],
        input_output_aliases={2: 0, 3: 1},
        compiler_params=pltpu.CompilerParams(vmem_limit_bytes=cfg["vmem_limit"]),
    )(slots, qkv, k_cache, v_cache)


# --------------------------------- layer ------------------------------------


def flash_qwen_layer(
    params, hidden_states, residual, cos, sin, cu_seqlen_prefill, kv_cache,
    block_tables, slots, input_lengths, max_s, adapter_data,
    *, num_heads, head_size, intermediate_size, eps,
):
    # TODO(synk): decode path (cu_seqlen_prefill is None -> paged single-query
    # cached-KV attention), LoRA adapter_data and tensor-parallel collectives
    # are not implemented.
    del cu_seqlen_prefill, block_tables, input_lengths, max_s, adapter_data
    del intermediate_size
    cfg = _device_config()
    proj = num_heads * head_size

    # RoPE tables expanded once in glue: cos_full = [cos, cos],
    # sin_signed = [-sin, sin]; in-kernel rope(x) = x*cos_full + swap_halves(x)*sin_signed.
    cos_full = jnp.concatenate([cos, cos], axis=-1).astype(jnp.float32)
    sin_signed = jnp.concatenate([-sin, sin], axis=-1).astype(jnp.float32)

    normed, res = rmsnorm(hidden_states, residual, params["ln_1_w"], eps, cfg)

    # Fused QKV projection + bias + RoPE; output stays (T, 3*H*D) in bf16.
    qkv = qkv_rope(normed, params["c_attn_w"], params["c_attn_b"],
                   cos_full, sin_signed, num_heads=num_heads,
                   head_size=head_size, cfg=cfg)

    # paged_attn.reshape_and_cache (in-place scatter of the new K/V rows).
    k_cache, v_cache = kv_cache_update(qkv, kv_cache[0], kv_cache[1], slots,
                                       proj=proj, cfg=cfg)

    attn = flash_attention(qkv, num_heads=num_heads, head_size=head_size,
                           sm_scale=head_size ** (-0.5), cfg=cfg)
    attn_output = linear(attn, params["c_proj_w"], cfg=cfg,
                         out_dtype=hidden_states.dtype)

    normed2, attn_res = rmsnorm(attn_output, res, params["ln_2_w"], eps, cfg)
    act = gate_up_silu(normed2, params["gate_w"], params["up_w"], cfg=cfg)
    mlp_output = linear(act, params["mlp_c_proj_w"], cfg=cfg,
                        out_dtype=hidden_states.dtype)
    return mlp_output, attn_res, (k_cache, v_cache)


# ------------------------- pure-JAX reference (f32) --------------------------


def reference_layer(p, hidden_states, residual, cos, sin, kv_cache, slots, *,
                    num_heads, head_size, eps):
    hp = "highest"
    T = hidden_states.shape[0]
    proj = num_heads * head_size

    def rms(x, r, w):
        s = x + (r if r is not None else 0.0)
        var = jnp.mean(s * s, axis=-1, keepdims=True)
        return s * jax.lax.rsqrt(var + eps) * w, s

    normed, res = rms(hidden_states, residual, p["ln_1_w"])
    qkv = jnp.dot(normed, p["c_attn_w"], precision=hp) + p["c_attn_b"]
    q = qkv[:, :proj].reshape(T, num_heads, head_size)
    k = qkv[:, proj:2 * proj].reshape(T, num_heads, head_size)
    v = qkv[:, 2 * proj:].reshape(T, num_heads, head_size)

    def rope(x):
        d2 = head_size // 2
        x1, x2 = x[..., :d2], x[..., d2:]
        c, s = cos[:, None, :], sin[:, None, :]
        return jnp.concatenate([x1 * c - x2 * s, x1 * s + x2 * c], axis=-1)

    q, kr = rope(q), rope(k)
    scores = jnp.einsum("thd,shd->hts", q, kr, precision=hp) * head_size ** (-0.5)
    mask = jnp.tril(jnp.ones((T, T), bool))
    scores = jnp.where(mask[None], scores, -1e30)
    probs = jax.nn.softmax(scores, axis=-1)
    ctx = jnp.einsum("hts,shd->thd", probs, v, precision=hp).reshape(T, proj)
    attn_out = jnp.dot(ctx, p["c_proj_w"], precision=hp)

    normed2, attn_res = rms(attn_out, res, p["ln_2_w"])
    g = jnp.dot(normed2, p["gate_w"], precision=hp)
    u = jnp.dot(normed2, p["up_w"], precision=hp)
    mlp_out = jnp.dot(jax.nn.silu(g) * u, p["mlp_c_proj_w"], precision=hp)

    k_cache = kv_cache[0].at[slots].set(kr.reshape(T, proj))
    v_cache = kv_cache[1].at[slots].set(v.reshape(T, proj))
    return mlp_out, attn_res, (k_cache, v_cache)


# ---------------------------------- main ------------------------------------


if __name__ == "__main__":
    num_tokens = 256
    hidden_size = 1024
    num_heads = 8
    head_size = hidden_size // num_heads          # kv_channels = 128
    projection_size = num_heads * head_size       # 1024
    intermediate_size = 2048
    inter_half = intermediate_size // 2
    layer_norm_epsilon = 1e-6
    rope_theta = 10000.0
    num_slots = 512

    key = jax.random.PRNGKey(0)
    ks = jax.random.split(key, 12)
    scale = 0.02

    # f32 master weights (reference); Pallas kernels consume bf16 copies of the
    # matmul weights (pre-transposed to [in, out]).
    pf32 = {
        "ln_1_w": 1.0 + 0.01 * jax.random.normal(ks[0], (hidden_size,), jnp.float32),
        "ln_2_w": 1.0 + 0.01 * jax.random.normal(ks[1], (hidden_size,), jnp.float32),
        "c_attn_w": scale * jax.random.normal(ks[2], (hidden_size, 3 * projection_size), jnp.float32),
        "c_attn_b": scale * jax.random.normal(ks[3], (3 * projection_size,), jnp.float32),
        "c_proj_w": scale * jax.random.normal(ks[4], (projection_size, hidden_size), jnp.float32),
        "gate_w": scale * jax.random.normal(ks[5], (hidden_size, inter_half), jnp.float32),   # mlp.w2
        "up_w": scale * jax.random.normal(ks[6], (hidden_size, inter_half), jnp.float32),     # mlp.w1
        "mlp_c_proj_w": scale * jax.random.normal(ks[7], (inter_half, hidden_size), jnp.float32),
    }
    params = dict(pf32)
    for name in ("c_attn_w", "c_proj_w", "gate_w", "up_w", "mlp_c_proj_w"):
        params[name] = pf32[name].astype(jnp.bfloat16)

    hidden_states = jax.random.normal(ks[8], (num_tokens, hidden_size), jnp.float32)
    residual = jax.random.normal(ks[9], (num_tokens, hidden_size), jnp.float32)

    # Rotary tables (GPT-NeoX style), shape (T, head_size // 2).
    positions = jnp.arange(num_tokens, dtype=jnp.float32)
    inv_freq = 1.0 / (rope_theta ** (jnp.arange(0, head_size, 2, dtype=jnp.float32) / head_size))
    freqs = positions[:, None] * inv_freq[None, :]
    cos = jnp.cos(freqs)
    sin = jnp.sin(freqs)

    # Simplified flat KV cache layout: [num_slots, num_kv_heads * head_size], bf16.
    kv_cache = (jnp.zeros((num_slots, projection_size), jnp.bfloat16),
                jnp.zeros((num_slots, projection_size), jnp.bfloat16))
    slots = jax.random.permutation(ks[10], num_slots)[:num_tokens].astype(jnp.int32)
    cu_seqlen_prefill = jnp.array([0, num_tokens], jnp.int32)
    input_lengths = jnp.array([num_tokens], jnp.int32)

    mlp_output, attn_res, new_kv_cache = flash_qwen_layer(
        params, hidden_states, residual, cos, sin, cu_seqlen_prefill, kv_cache,
        None, slots, input_lengths, num_tokens, None,
        num_heads=num_heads, head_size=head_size,
        intermediate_size=intermediate_size, eps=layer_norm_epsilon)
    jax.block_until_ready((mlp_output, attn_res, new_kv_cache))

    assert mlp_output.shape == (num_tokens, hidden_size)
    assert attn_res.shape == (num_tokens, hidden_size)

    # Numerical check against a pure-JAX f32 reference (bf16 MXU tolerance).
    ref_kv_cache = (jnp.zeros((num_slots, projection_size), jnp.float32),
                    jnp.zeros((num_slots, projection_size), jnp.float32))
    ref_mlp, ref_res, ref_kv = reference_layer(
        pf32, hidden_states, residual, cos, sin, ref_kv_cache, slots,
        num_heads=num_heads, head_size=head_size, eps=layer_norm_epsilon)

    def _assert_close(name, got, want, atol=5e-2, rtol=5e-2):
        got = np.asarray(got, dtype=np.float32)
        want = np.asarray(want, dtype=np.float32)
        if not np.allclose(got, want, atol=atol, rtol=rtol):
            raise AssertionError(f"{name}: max abs err {np.max(np.abs(got - want))}")

    _assert_close("mlp_output", mlp_output, ref_mlp)
    _assert_close("attn_res", attn_res, ref_res)
    _assert_close("k_cache", new_kv_cache[0], ref_kv[0])
    _assert_close("v_cache", new_kv_cache[1], ref_kv[1])

    print("KERNEL_OK")
</pallas_src>

<mosaic_0001>
module attributes {stable_mosaic.version = 11 : i64} {
  func.func @rmsnorm_residual_kernel(%arg0: i32, %arg1: memref<128x1024xf32, #tpu.memory_space<vmem>>, %arg2: memref<128x1024xf32, #tpu.memory_space<vmem>>, %arg3: memref<1x1024xf32, #tpu.memory_space<vmem>>, %arg4: memref<128x1024xbf16, #tpu.memory_space<vmem>>, %arg5: memref<128x1024xf32, #tpu.memory_space<vmem>>) attributes {dimension_semantics = [#tpu.dimension_semantics<parallel>], iteration_bounds = array<i64: 2>, scalar_prefetch = 0 : i64, scratch_operands = 0 : i64, tpu.core_type = #tpu.core_type<tc>, window_params = [{transform_indices = @transform_0, window_bounds = array<i64: 128, 1024>}, {transform_indices = @transform_1, window_bounds = array<i64: 128, 1024>}, {pipeline_mode = #tpu.pipeline_mode<synchronous>, transform_indices = @transform_2, window_bounds = array<i64: 1, 1024>}, {transform_indices = @transform_3, window_bounds = array<i64: 128, 1024>}, {transform_indices = @transform_4, window_bounds = array<i64: 128, 1024>}]} {
    %c0 = arith.constant 0 : index
    %c0_0 = arith.constant 0 : index
    %0 = vector.load %arg1[%c0, %c0_0] : memref<128x1024xf32, #tpu.memory_space<vmem>>, vector<128x1024xf32>
    %c0_1 = arith.constant 0 : index
    %c0_2 = arith.constant 0 : index
    %1 = vector.load %arg2[%c0_1, %c0_2] : memref<128x1024xf32, #tpu.memory_space<vmem>>, vector<128x1024xf32>
    %2 = arith.addf %0, %1 : vector<128x1024xf32>
    %c0_3 = arith.constant 0 : index
    %c0_4 = arith.constant 0 : index
    %3 = vector.load %arg5[%c0_3, %c0_4] : memref<128x1024xf32, #tpu.memory_space<vmem>>, vector<128x1024xf32>
    tpu.vector_store %arg5[%c0_3, %c0_4], %2 {strides = array<i32>} : memref<128x1024xf32, #tpu.memory_space<vmem>>, vector<128x1024xf32>,
    %4 = arith.mulf %2, %2 : vector<128x1024xf32>
    %cst = arith.constant dense<0.000000e+00> : vector<128xf32>
    %5 = vector.multi_reduction <add>, %4, %cst [1] : vector<128x1024xf32> to vector<128xf32>
    %6 = vector.shape_cast %5 : vector<128xf32> to vector<128x1xf32>
    %cst_5 = arith.constant 1.024000e+03 : f32
    %7 = vector.broadcast %cst_5 : f32 to vector<128x1xf32>
    %8 = arith.divf %6, %7 : vector<128x1xf32>
    %cst_6 = arith.constant 9.99999997E-7 : f32
    %9 = vector.broadcast %cst_6 : f32 to vector<128x1xf32>
    %10 = arith.addf %8, %9 : vector<128x1xf32>
    %11 = math.rsqrt %10 : vector<128x1xf32>
    %12 = vector.broadcast %11 : vector<128x1xf32> to vector<128x1024xf32>
    %13 = arith.mulf %2, %12 : vector<128x1024xf32>
    %c0_7 = arith.constant 0 : index
    %c0_8 = arith.constant 0 : index
    %14 = vector.load %arg3[%c0_7, %c0_8] : memref<1x1024xf32, #tpu.memory_space<vmem>>, vector<1x1024xf32>
    %15 = vector.broadcast %14 : vector<1x1024xf32> to vector<128x1024xf32>
    %16 = arith.mulf %13, %15 : vector<128x1024xf32>
    %17 = arith.truncf %16 : vector<128x1024xf32> to vector<128x1024xbf16>
    %c0_9 = arith.constant 0 : index
    %c0_10 = arith.constant 0 : index
    %18 = vector.load %arg4[%c0_9, %c0_10] : memref<128x1024xbf16, #tpu.memory_space<vmem>>, vector<128x1024xbf16>
    tpu.vector_store %arg4[%c0_9, %c0_10], %17 {strides = array<i32>} : memref<128x1024xbf16, #tpu.memory_space<vmem>>, vector<128x1024xbf16>,
    return
  }
  func.func @transform_0(%arg0: i32) -> (i32, i32) {
    %c0_i32 = arith.constant 0 : i32
    %c0_i32_0 = arith.constant 0 : i32
    return %arg0, %c0_i32 : i32, i32
  }
  func.func @transform_1(%arg0: i32) -> (i32, i32) {
    %c0_i32 = arith.constant 0 : i32
    %c0_i32_0 = arith.constant 0 : i32
    return %arg0, %c0_i32 : i32, i32
  }
  func.func @transform_2(%arg0: i32) -> (i32, i32) {
    %c0_i32 = arith.constant 0 : i32
    %c0_i32_0 = arith.constant 0 : i32
    %c0_i32_1 = arith.constant 0 : i32
    return %c0_i32, %c0_i32_0 : i32, i32
  }
  func.func @transform_3(%arg0: i32) -> (i32, i32) {
    %c0_i32 = arith.constant 0 : i32
    %c0_i32_0 = arith.constant 0 : i32
    return %arg0, %c0_i32 : i32, i32
  }
  func.func @transform_4(%arg0: i32) -> (i32, i32) {
    %c0_i32 = arith.constant 0 : i32
    %c0_i32_0 = arith.constant 0 : i32
    return %arg0, %c0_i32 : i32, i32
  }
}

</mosaic_0001>

<bundles_post_ra>
// kernel: tpu_custom_call.1
= control target key start
LH: loop header
LB: loop body
LE: loop exit
PB: predicated region body
PF: predicated region fallthrough
CT: control target
= control target key end

     0   :  { %s4231_s0 = inlined_call_operand.hbm [shape: f32[256,1024], index: 0, kind: input, shape index: {}]   ;;  %s4232_s1 = inlined_call_operand.hbm [shape: f32[256,1024], index: 1, kind: input, shape index: {}]   ;;  %s4233_s2 = inlined_call_operand.hbm [shape: f32[1,1024], index: 2, kind: input, shape index: {}]   ;;  %s4234_s3 = inlined_call_operand.hbm [shape: bf16[256,1024], index: 3, kind: output, shape index: {0}]   ;;  %s4235_s4 = inlined_call_operand.hbm [shape: f32[256,1024], index: 4, kind: output, shape index: {1}]  }
   0x1   :  { %4333 = sst [smem:[#allocation108_spill]] %s4231_s0 }
   0x2   :  { %10 = vsyncpa [#allocation3], 0 }
   0x3   :  { %12 = vsyncpa [#allocation3 + $0x1], 0 }
   0x4   :  { %13 = vsyncpa [#allocation6], 0 }
   0x5   :  { %15 = vsyncpa [#allocation6 + $0x1], 0 }
   0x6   :  { %16 = vsyncpa [#allocation4], 0 }
   0x7   :  { %18 = vsyncpa [#allocation4 + $0x1], 0 }
   0x8   :  { %19 = vsyncpa [#allocation10], 0 }
   0x9   :  { %21 = vsyncpa [#allocation10 + $0x1], 0  ;;  %s2539_s15 = smov 0   ;;  %s2541_s16 = smov 0  }
   0xa   :  { %s2543_s17 = smov 0   ;;  %s2545_s18 = smov 0  }
   0xb LB: > { %s2560_s19 = sadd.s32 4294967295, %s2501_s18   ;;  %s2038_s20 = sadd.s32 4294967294, %s2501_s18   ;;  %s2501_s18 = sphi %s2545_s18, %s4538_s18   ;;  %s2497_s17 = sphi %s2543_s17, %s4537_s17   ;;  %s2493_s16 = sphi %s2541_s16, %s4536_s16   ;;  %s2489_s15 = sphi %s2539_s15, %s4535_s15  }
   0xc   : > { %s2564_s21 = sadd.s32 1, %s2501_s18   ;;  %s34_s22 = sadd.s32 1, %s2497_s17 }
   0xd   : > { %s31_s23 = ssub.s32 %s2501_s18, %s2564_s21  ;;  %p41_p0 = scmp.ne.s32.totalorder %s2497_s17, %s2493_s16 }
   0xe   : > { %p32_p1 = scmp.eq.s32.totalorder %s31_s23, 0  ;;  %p42_p2 = scmp.eq.s32.totalorder %s2501_s18, 0 }
   0xf   : > { %p47_p3 = scmp.ne.s32.totalorder %s2493_s16, %s2489_s15  ;;  %p4236_p4 = scmp.eq.s32.totalorder %s2560_s19, 0 }
  0x10   : > { %s2576_s24 = scalar_select %p32_p1, %s2497_s17, %s34_s22  }
  0x11   : > { %p2578_p5 = por %p42_p2, %p41_p0  ;;  %p2584_p6 = por %p4236_p4, %p47_p3 }
  0x12   : > { %p118_p7 = scmp.eq.s32.totalorder %s2560_s19, 1  ;;  %p124_p8 = scmp.eq.s32.totalorder %s2038_s20, 1 }
  0x13   : > { %s4335_s26 = scalar_select %p2584_p6, 1, 0 }
  0x14   : > { %p2039_p9 = scmp.ge.s32.totalorder %s2501_s18, 1  ;;  %p157_p10 = scmp.lt.s32.totalorder %s2501_s18, 3 }
  0x15   : > { %p2591_p11 = por %p118_p7, %p41_p0  ;;  %p2595_p12 = por %p124_p8, %p47_p3 }
  0x16   : > { %p2599_p13 = pnand %p2039_p9, %p157_p10  ;;  %s2503_s30 = smov [#allocation7]  }
  0x17   : > { %s4336_s27 = scalar_select %p2591_p11, 1, 0 }
  0x18   : > { %s4337_s28 = scalar_select %p2595_p12, 1, 0 }
  0x19   : > { %s4338_s29 = scalar_select %p2599_p13, 1, 0 }
  0x1a   : > { %p2214_p2 = pneg %p2599_p13  ;;  %s170_s5 = sshll.u32 %s2503_s30, 4  ;;  %s171_s5 = int_to_ptr.vmem [resolvable:$true] %s170_s5 }
  0x1b   : > { %p2233_p4 = scmp.lt.s32.totalorder %s2501_s18, 2  ;;  %p4339_p0 = scmp.eq.s32.totalorder %s2560_s19, 0 }
  0x1c   : > { %s181_s7 = sand.u32 1, %s2497_s17   ;;  %s2307_s12 = scalar_lea.hbm %s4233_s2, 128 }
  0x1d   : > { %p2609_p7 = pnand %p2214_p2, %p4339_p0  ;;  %p2616_p3 = pnand %p2233_p4, %p2578_p5 }
  0x1e   : > { %s2620_s9 = sshll.u32 %s181_s7, 10  ;;  %p2308_p8 = scmp.ne.s32.totalorder %s4233_s2, %s2307_s12 }
  0x1f   : > { %s4341_s8 = scalar_select %p2616_p3, 1, 0 }
  0x20   : > { %p2309_p9 = pneg %p2609_p7  ;;  %p2314_p4 = scmp.lt.u32.totalorder %s2307_s12, %s4233_s2 }
  0x22   : > { %p2310_p10 = pnand %p2309_p9, %p2308_p8 }
  0x24   : > { %p2311_p2 = pneg %p2310_p10 }
  0x26   : > { %p2316_p5 = pnand %p2314_p4, %p2311_p2 }
  0x28   : > { %2319 = shalt.err (!%p2316_p5)
}
  0x29   : > { %s2320_s23 = scalar_lea.vmem %s171_s5, 128  ;;  %p2328_p11 = scmp.lt.s32.totalorder %s171_s5, %s171_s5 }
  0x2a   : > { %p2321_p0 = scmp.ne.s32.totalorder %s171_s5, %s2320_s23  ;;  %p2329_p6 = scmp.lt.s32.totalorder %s2320_s23, %s2320_s23 }
  0x2c   : > { %p2323_p1 = pnand %p2321_p0, %p2309_p9  ;;  %p2330_p13 = por %p2329_p6, %p2328_p11 }
  0x2e   : > { %p2324_p12 = pneg %p2323_p1 }
  0x30   : > { %p2331_p3 = pnand %p2330_p13, %p2324_p12 }
  0x32   : > { %2334 = shalt.err (!%p2331_p3)
}
  0x33   : > { %2217 = dma.hbm_to_vmem [thread:$0]  (!%p2609_p7), %s4233_s2, 128, %s171_s5, [#allocation6]  }
  0x34   : > { %s2131_s10 = sshll.u32 %s2501_s18, 14  ;;  %s185_s11 = scalar_lea.vmem [#allocation2], %s2620_s9 }
  0x35   : > { %s193_s12 = sshll.u32 %s185_s11, 4  ;;  %s4342_s0 = sld [smem:[#allocation108_spill]]  ;;  %s2647_s12 = int_to_ptr.vmem [resolvable:$true] %s193_s12 }
  0x36   : > { %s2649_s6 = scalar_lea.sflag [#allocation3], %s181_s7  ;;  %p4343_p11 = scmp.ne.s32.totalorder %s4341_s8, 0 }
  0x38   : > { %p2337_p12 = pneg %p4343_p11 }
  0x3b   : > { %s2645_s20 = scalar_lea.hbm %s4342_s0, %s2131_s10  ;;  %s2340_s25 = scalar_lea.hbm %s4342_s0, 32768 }
  0x3c   : > { %s2335_s22 = scalar_lea.hbm %s2645_s20, 16384  ;;  %p2341_p7 = scmp.lt.u32.totalorder %s2645_s20, %s4342_s0 }
  0x3d   : > { %p2336_p6 = scmp.ne.s32.totalorder %s2645_s20, %s2335_s22  ;;  %p2342_p3 = scmp.lt.u32.totalorder %s2340_s25, %s2335_s22 }
  0x3e   : > { %p2344_p9 = scmp.lt.u32.totalorder %s2335_s22, %s2645_s20 }
  0x3f   : > { %p2338_p13 = pnand %p2337_p12, %p2336_p6  ;;  %p2343_p8 = por %p2342_p3, %p2341_p7 }
  0x41   : > { %p2339_p1 = pneg %p2338_p13  ;;  %p2345_p10 = por %p2344_p9, %p2343_p8 }
  0x43   : > { %p2346_p2 = pnand %p2345_p10, %p2339_p1 }
  0x45   : > { %2349 = shalt.err (!%p2346_p2)
}
  0x46   : > { %s2350_s7 = scalar_lea.vmem %s2647_s12, 16384  ;;  %s2504_s13 = smov [#allocation2]  }
  0x47   : > { %p2351_p4 = scmp.ne.s32.totalorder %s2647_s12, %s2350_s7  ;;  %s2355_s14 = sshll.u32 %s2504_s13, 4  ;;  %s2356_s14 = int_to_ptr.vmem [resolvable:$false] %s2355_s14 }
  0x48   : > { %s2357_s5 = scalar_lea.vmem %s2356_s14, 32768  ;;  %p2358_p6 = scmp.lt.s32.totalorder %s2647_s12, %s2356_s14 }
  0x49   : > { %p2353_p5 = pnand %p2351_p4, %p2337_p12  ;;  %p2359_p13 = scmp.lt.s32.totalorder %s2357_s5, %s2350_s7 }
  0x4b   : > { %p2354_p0 = pneg %p2353_p5  ;;  %p2360_p7 = por %p2359_p13, %p2358_p6 }
  0x4d   : > { %p2361_p3 = pnand %p2360_p7, %p2354_p0 }
  0x4f   : > { %2364 = shalt.err (!%p2361_p3)
}
  0x50   : > { %s2505_s22 = smov 1024   ;;  %s2506_s23 = smov 64  }
  0x51   : > { %2221 = dma.hbm_to_vmem [thread:$0]  (!%p4343_p11), %s2645_s20, 16384, %s2647_s12, %s2649_s6, %s2505_s22, %s2505_s22, %s2506_s23  }
  0x52   : > { %s2685_s11 = scalar_lea.hbm %s4232_s1, %s2131_s10  ;;  %s207_s7 = scalar_lea.vmem [#allocation5], %s2620_s9 }
  0x53   : > { %s215_s13 = sshll.u32 %s207_s7, 4  ;;  %s203_s14 = sand.u32 1, %s2501_s18   ;;  %s2689_s13 = int_to_ptr.vmem [resolvable:$true] %s215_s13 }
  0x54   : > { %s2691_s5 = scalar_lea.sflag [#allocation6], %s203_s14  ;;  %s2365_s0 = scalar_lea.hbm %s2685_s11, 16384 }
  0x55   : > { %p2366_p1 = scmp.ne.s32.totalorder %s2685_s11, %s2365_s0  ;;  %s2370_s20 = scalar_lea.hbm %s4232_s1, 32768 }
  0x56   : > { %p2371_p10 = scmp.lt.u32.totalorder %s2685_s11, %s4232_s1  ;;  %p2372_p2 = scmp.lt.u32.totalorder %s2370_s20, %s2365_s0 }
  0x57   : > { %p2368_p8 = pnand %p2366_p1, %p2337_p12  ;;  %p2374_p5 = scmp.lt.u32.totalorder %s2365_s0, %s2685_s11 }
  0x58   : > { %p2373_p4 = por %p2372_p2, %p2371_p10 }
  0x59   : > { %p2369_p9 = pneg %p2368_p8 }
  0x5a   : > { %p2375_p0 = por %p2374_p5, %p2373_p4 }
  0x5c   : > { %p2376_p6 = pnand %p2375_p0, %p2369_p9 }
  0x5e   : > { %2379 = shalt.err (!%p2376_p6)
}
  0x5f   : > { %s2380_s9 = scalar_lea.vmem %s2689_s13, 16384  ;;  %s2507_s30 = smov [#allocation5]  }
  0x60   : > { %p2381_p13 = scmp.ne.s32.totalorder %s2689_s13, %s2380_s9  ;;  %s2385_s7 = sshll.u32 %s2507_s30, 4  ;;  %s2386_s7 = int_to_ptr.vmem [resolvable:$false] %s2385_s7 }
  0x61   : > { %s2387_s14 = scalar_lea.vmem %s2386_s7, 32768  ;;  %p2388_p1 = scmp.lt.s32.totalorder %s2689_s13, %s2386_s7 }
  0x62   : > { %p2383_p7 = pnand %p2381_p13, %p2337_p12  ;;  %p2389_p8 = scmp.lt.s32.totalorder %s2387_s14, %s2380_s9 }
  0x64   : > { %p2384_p3 = pneg %p2383_p7  ;;  %p2390_p10 = por %p2389_p8, %p2388_p1 }
  0x66   : > { %p2391_p2 = pnand %p2390_p10, %p2384_p3 }
  0x68   : > { %2394 = shalt.err (!%p2391_p2)
}
  0x69   : > { %2224 = dma.hbm_to_vmem [thread:$0]  (!%p4343_p11), %s2685_s11, 16384, %s2689_s13, %s2691_s5, %s2505_s22, %s2505_s22, %s2506_s23  }
  0x6a   : > { %p4344_p12 = scmp.ne.s32.totalorder %s4338_s29, 0 }
  0x6c   : > { %227 = sbr.rel (%p4344_p12) target bundleno = 442 (0x1ba), region = 32 }
  0x73   : > { %s2723_s0 = sand.u32 1, %s2493_s16   ;;  %p4345_p9 = scmp.ne.s32.totalorder %s4335_s26, 0 }
  0x74   : > { %s2726_s12 = sshll.u32 %s2723_s0, 10  ;;  %s230_s8 = scalar_lea.sflag [#allocation3], %s2723_s0 }
  0x75   : > { %s2730_s10 = scalar_lea.vmem [#allocation2], %s2726_s12 }
  0x76   : > { %2468 = dma.done.wait (%p4345_p9), %s230_s8, 16384  }
  0x77   : > { %2470 = vsyncadd (%p4345_p9), %s230_s8, 4294950912  ;;  %s238_s29 = sand.u32 1, %s2560_s19   ;;  %s2738_s23 = scalar_lea.vmem [#allocation5], %s2726_s12 }
  0x78   : > { %s239_s22 = scalar_lea.sflag [#allocation6], %s238_s29 }
  0x79   : > { %2472 = dma.done.wait (%p4345_p9), %s239_s22, 16384  }
  0x7a   : > { %2474 = vsyncadd (%p4345_p9), %s239_s22, 4294950912  ;;  %p4346_p11 = scmp.eq.s32.totalorder %s2560_s19, 0 }
  0x7c   : > { %2476 = dma.done.wait (%p4346_p11), [#allocation6], 128   ;;  %p4347_p4 = pmov %p4346_p11 }
  0x7d   : > { %v301_v0 = vld [vmem:[%s2730_s10 + $0x80] sm:$0xff]  ;;  %v302_v1 = vld [vmem:[%s2730_s10 + $0x88] sm:$0xff]  ;;  %v303_v2 = vld [vmem:[%s2730_s10 + $0x90] sm:$0xff]  ;;  %s2781_s26 = scalar_lea.vmem [#allocation9], %s2726_s12  ;;  %s2201_s11 = sshll.u32 %s2560_s19, 14 }
  0x7e   : > { %2478 = vsyncadd (%p4347_p4), [#allocation6], 4294967168  ;;  %v304_v3 = vld [vmem:[%s2730_s10 + $0x98] sm:$0xff]  ;;  %v305_v4 = vld [vmem:[%s2730_s10 + $0xa0] sm:$0xff]  ;;  %s1901_s13 = sshll.u32 %s2781_s26, 4  ;;  %s3804_s6 = scalar_lea.hbm %s4235_s4, %s2201_s11  ;;  %s3806_s13 = int_to_ptr.vmem [resolvable:$true] %s1901_s13 }
  0x7f   : > { %v306_v5 = vld [vmem:[%s2730_s10 + $0xa8] sm:$0xff]  ;;  %v307_v6 = vld [vmem:[%s2730_s10 + $0xb0] sm:$0xff]  ;;  %v308_v7 = vld [vmem:[%s2730_s10 + $0xb8] sm:$0xff]  ;;  %s1870_s25 = scalar_lea.sflag [#allocation10], %s2723_s0  ;;  %s2395_s9 = scalar_lea.vmem %s3806_s13, 16384 }
  0x80   : > { %v429_v8 = vld [vmem:[%s2738_s23 + $0x80] sm:$0xff]  ;;  %v430_v9 = vld [vmem:[%s2738_s23 + $0x88] sm:$0xff]  ;;  %v431_v10 = vld [vmem:[%s2738_s23 + $0x90] sm:$0xff]  ;;  %p2396_p5 = scmp.ne.s32.totalorder %s3806_s13, %s2395_s9  ;;  %p4440_p0 = scmp.ne.s32.totalorder %s4336_s27, 0 }
  0x81   : > { %v432_v11 = vld [vmem:[%s2738_s23 + $0x98] sm:$0xff]  ;;  %v2760_v12 = vadd.f32 %v429_v8, %v301_v0  ;;  %v433_v13 = vld [vmem:[%s2738_s23 + $0xa0] sm:$0xff]  ;;  %v434_v14 = vld [vmem:[%s2738_s23 + $0xa8] sm:$0xff]  ;;  %v2765_v16 = vadd.f32 %v430_v9, %v302_v1  ;;  %v2767_v17 = vadd.f32 %v431_v10, %v303_v2  ;;  %s2508_s30 = smov [#allocation9]  }
  0x82   : > { %v435_v15 = vld [vmem:[%s2738_s23 + $0xb0] sm:$0xff]  ;;  %v2769_v18 = vadd.f32 %v432_v11, %v304_v3  ;;  %v436_v19 = vld [vmem:[%s2738_s23 + $0xb8] sm:$0xff]  ;;  %v2772_v20 = vadd.f32 %v433_v13, %v305_v4  ;;  %v2774_v21 = vadd.f32 %v434_v14, %v306_v5  ;;  %v285_v24 = vld [vmem:[%s2730_s10] sm:$0xff]  ;;  %p2397_p6 = pnand %p2396_p5, %p4440_p0  ;;  %s2399_s7 = sshll.u32 %s2508_s30, 4  ;;  %s2400_s7 = int_to_ptr.vmem [resolvable:$false] %s2399_s7 }
  0x83   : > { %v2776_v22 = vadd.f32 %v435_v15, %v307_v6  ;;  %v813_v23 = vmul.f32 %v2760_v12, %v2760_v12  ;;  %685 = vst [vmem:[%s2781_s26 + $0x80] sm:$0xff] %v2760_v12  ;;  %v286_v25 = vld [vmem:[%s2730_s10 + $0x8] sm:$0xff]  ;;  %v2787_v26 = vadd.f32 %v436_v19, %v308_v7  ;;  %686 = vst [vmem:[%s2781_s26 + $0x88] sm:$0xff] %v2765_v16  ;;  %v287_v29 = vld [vmem:[%s2730_s10 + $0x10] sm:$0xff]  ;;  %s2401_s14 = scalar_lea.vmem %s2400_s7, 32768  ;;  %p2402_p7 = scmp.lt.s32.totalorder %s3806_s13, %s2400_s7 }
  0x84   : > { %687 = vst [vmem:[%s2781_s26 + $0x90] sm:$0xff] %v2767_v17  ;;  %688 = vst [vmem:[%s2781_s26 + $0x98] sm:$0xff] %v2769_v18  ;;  %v814_v27 = vmul.f32 %v2765_v16, %v2765_v16  ;;  %v815_v28 = vmul.f32 %v2767_v17, %v2767_v17  ;;  %v288_v30 = vld [vmem:[%s2730_s10 + $0x18] sm:$0xff]  ;;  %v289_v31 = vld [vmem:[%s2730_s10 + $0x20] sm:$0xff]  ;;  %v816_v35 = vmul.f32 %v2769_v18, %v2769_v18  ;;  %p2398_p13 = pneg %p2397_p6  ;;  %p2403_p3 = scmp.lt.s32.totalorder %s2401_s14, %s2395_s9 }
  0x85   : > { %689 = vst [vmem:[%s2781_s26 + $0xa0] sm:$0xff] %v2772_v20  ;;  %690 = vst [vmem:[%s2781_s26 + $0xa8] sm:$0xff] %v2774_v21  ;;  %v290_v32 = vld [vmem:[%s2730_s10 + $0x28] sm:$0xff]  ;;  %v291_v33 = vld [vmem:[%s2730_s10 + $0x30] sm:$0xff]  ;;  %v817_v40 = vmul.f32 %v2772_v20, %v2772_v20  ;;  %v818_v61 = vmul.f32 %v2774_v21, %v2774_v21  ;;  %v819_v62 = vmul.f32 %v2776_v22, %v2776_v22 }
  0x86   : > { %691 = vst [vmem:[%s2781_s26 + $0xb0] sm:$0xff] %v2776_v22  ;;  %v292_v34 = vld [vmem:[%s2730_s10 + $0x38] sm:$0xff]  ;;  %692 = vst [vmem:[%s2781_s26 + $0xb8] sm:$0xff] %v2787_v26  ;;  %v943_v36 = vadd.f32 %v814_v27, %v813_v23  ;;  %v413_v37 = vld [vmem:[%s2738_s23] sm:$0xff]  ;;  %v820_v4 = vmul.f32 %v2787_v26, %v2787_v26  ;;  %p2404_p1 = por %p2403_p3, %p2402_p7 }
  0x87   : > { %v414_v38 = vld [vmem:[%s2738_s23 + $0x8] sm:$0xff]  ;;  %v415_v39 = vld [vmem:[%s2738_s23 + $0x10] sm:$0xff]  ;;  %v416_v41 = vld [vmem:[%s2738_s23 + $0x18] sm:$0xff]  ;;  %v2823_v44 = vadd.f32 %v413_v37, %v285_v24 }
  0x88   : > { %v417_v42 = vld [vmem:[%s2738_s23 + $0x20] sm:$0xff]  ;;  %v418_v43 = vld [vmem:[%s2738_s23 + $0x28] sm:$0xff]  ;;  %v2825_v45 = vadd.f32 %v414_v38, %v286_v25  ;;  %v2827_v46 = vadd.f32 %v415_v39, %v287_v29  ;;  %v944_v47 = vadd.f32 %v943_v36, %v815_v28  ;;  %v419_v48 = vld [vmem:[%s2738_s23 + $0x30] sm:$0xff]  ;;  %v2831_v50 = vadd.f32 %v416_v41, %v288_v30  ;;  %p2405_p8 = pnand %p2404_p1, %p2398_p13 }
  0x89   : > { %v420_v49 = vld [vmem:[%s2738_s23 + $0x38] sm:$0xff]  ;;  %v2833_v51 = vadd.f32 %v417_v42, %v289_v31  ;;  %v2835_v52 = vadd.f32 %v418_v43, %v290_v32  ;;  %v309_v53 = vld [vmem:[%s2730_s10 + $0xc0] sm:$0xff]  ;;  %v2838_v54 = vadd.f32 %v419_v48, %v291_v33  ;;  %v797_v56 = vmul.f32 %v2823_v44, %v2823_v44  ;;  %669 = vst [vmem:[%s2781_s26] sm:$0xff] %v2823_v44  ;;  %v310_v58 = vld [vmem:[%s2730_s10 + $0xc8] sm:$0xff] }
  0x8a   : > { %v2840_v55 = vadd.f32 %v420_v49, %v292_v34  ;;  %670 = vst [vmem:[%s2781_s26 + $0x8] sm:$0xff] %v2825_v45  ;;  %671 = vst [vmem:[%s2781_s26 + $0x10] sm:$0xff] %v2827_v46  ;;  %v798_v57 = vmul.f32 %v2825_v45, %v2825_v45  ;;  %v311_v59 = vld [vmem:[%s2730_s10 + $0xd0] sm:$0xff]  ;;  %v312_v60 = vld [vmem:[%s2730_s10 + $0xd8] sm:$0xff]  ;;  %v945_v63 = vadd.f32 %v944_v47, %v816_v35 }
  0x8b   : > { %672 = vst [vmem:[%s2781_s26 + $0x18] sm:$0xff] %v2831_v50  ;;  %673 = vst [vmem:[%s2781_s26 + $0x20] sm:$0xff] %v2833_v51  ;;  %v799_v0 = vmul.f32 %v2827_v46, %v2827_v46  ;;  %v313_v1 = vld [vmem:[%s2730_s10 + $0xe0] sm:$0xff]  ;;  %v314_v2 = vld [vmem:[%s2730_s10 + $0xe8] sm:$0xff]  ;;  %v800_v5 = vmul.f32 %v2831_v50, %v2831_v50  ;;  %v801_v6 = vmul.f32 %v2833_v51, %v2833_v51 }
  0x8c   : > { %674 = vst [vmem:[%s2781_s26 + $0x28] sm:$0xff] %v2835_v52  ;;  %v315_v3 = vld [vmem:[%s2730_s10 + $0xf0] sm:$0xff]  ;;  %675 = vst [vmem:[%s2781_s26 + $0x30] sm:$0xff] %v2838_v54  ;;  %v925_v7 = vadd.f32 %v798_v57, %v797_v56  ;;  %v316_v8 = vld [vmem:[%s2730_s10 + $0xf8] sm:$0xff]  ;;  %v946_v11 = vadd.f32 %v945_v63, %v817_v40  ;;  %v802_v13 = vmul.f32 %v2835_v52, %v2835_v52 }
  0x8d   : > { %676 = vst [vmem:[%s2781_s26 + $0x38] sm:$0xff] %v2840_v55  ;;  %v437_v9 = vld [vmem:[%s2738_s23 + $0xc0] sm:$0xff]  ;;  %v438_v10 = vld [vmem:[%s2738_s23 + $0xc8] sm:$0xff]  ;;  %v439_v14 = vld [vmem:[%s2738_s23 + $0xd0] sm:$0xff]  ;;  %v803_v56 = vmul.f32 %v2838_v54, %v2838_v54  ;;  %v804_v57 = vmul.f32 %v2840_v55, %v2840_v55 }
  0x8e   : > { %v440_v15 = vld [vmem:[%s2738_s23 + $0xd8] sm:$0xff]  ;;  %v441_v19 = vld [vmem:[%s2738_s23 + $0xe0] sm:$0xff]  ;;  %v2888_v23 = vadd.f32 %v437_v9, %v309_v53  ;;  %v2890_v24 = vadd.f32 %v438_v10, %v310_v58  ;;  %v926_v25 = vadd.f32 %v925_v7, %v799_v0  ;;  %v442_v27 = vld [vmem:[%s2738_s23 + $0xe8] sm:$0xff]  ;;  %v2895_v30 = vadd.f32 %v439_v14, %v311_v59 }
  0x8f   : > { %v443_v28 = vld [vmem:[%s2738_s23 + $0xf0] sm:$0xff]  ;;  %v444_v29 = vld [vmem:[%s2738_s23 + $0xf8] sm:$0xff]  ;;  %v2897_v31 = vadd.f32 %v440_v15, %v312_v60  ;;  %v2899_v32 = vadd.f32 %v441_v19, %v313_v1  ;;  %v947_v33 = vadd.f32 %v946_v11, %v818_v61  ;;  %v2901_v34 = vadd.f32 %v442_v27, %v314_v2  ;;  %v293_v37 = vld [vmem:[%s2730_s10 + $0x40] sm:$0xff] }
  0x90   : > { %v2903_v35 = vadd.f32 %v443_v28, %v315_v3  ;;  %v2905_v36 = vadd.f32 %v444_v29, %v316_v8  ;;  %693 = vst [vmem:[%s2781_s26 + $0xc0] sm:$0xff] %v2888_v23  ;;  %694 = vst [vmem:[%s2781_s26 + $0xc8] sm:$0xff] %v2890_v24  ;;  %v294_v38 = vld [vmem:[%s2730_s10 + $0x48] sm:$0xff]  ;;  %v295_v39 = vld [vmem:[%s2730_s10 + $0x50] sm:$0xff]  ;;  %v927_v40 = vadd.f32 %v926_v25, %v800_v5 }
  0x91   : > { %695 = vst [vmem:[%s2781_s26 + $0xd0] sm:$0xff] %v2895_v30  ;;  %696 = vst [vmem:[%s2781_s26 + $0xd8] sm:$0xff] %v2897_v31  ;;  %v821_v41 = vmul.f32 %v2888_v23, %v2888_v23  ;;  %v822_v42 = vmul.f32 %v2890_v24, %v2890_v24  ;;  %v823_v43 = vmul.f32 %v2895_v30, %v2895_v30  ;;  %v296_v47 = vld [vmem:[%s2730_s10 + $0x58] sm:$0xff]  ;;  %v297_v48 = vld [vmem:[%s2730_s10 + $0x60] sm:$0xff] }
  0x92   : > { %697 = vst [vmem:[%s2781_s26 + $0xe0] sm:$0xff] %v2899_v32  ;;  %v298_v49 = vld [vmem:[%s2730_s10 + $0x68] sm:$0xff]  ;;  %v948_v53 = vadd.f32 %v947_v33, %v819_v62  ;;  %698 = vst [vmem:[%s2781_s26 + $0xe8] sm:$0xff] %v2901_v34  ;;  %v824_v58 = vmul.f32 %v2897_v31, %v2897_v31  ;;  %v299_v59 = vld [vmem:[%s2730_s10 + $0x70] sm:$0xff]  ;;  %v928_v62 = vadd.f32 %v927_v40, %v801_v6 }
  0x93   : > { %699 = vst [vmem:[%s2781_s26 + $0xf0] sm:$0xff] %v2903_v35  ;;  %700 = vst [vmem:[%s2781_s26 + $0xf8] sm:$0xff] %v2905_v36  ;;  %v300_v60 = vld [vmem:[%s2730_s10 + $0x78] sm:$0xff]  ;;  %v421_v61 = vld [vmem:[%s2738_s23 + $0x40] sm:$0xff]  ;;  %v825_v63 = vmul.f32 %v2899_v32, %v2899_v32  ;;  %v2948_v0 = vmul.f32 %v2901_v34, %v2901_v34  ;;  %v952_v1 = vadd.f32 %v822_v42, %v821_v41 }
  0x94   : > { %v422_v2 = vld [vmem:[%s2738_s23 + $0x48] sm:$0xff]  ;;  %v423_v3 = vld [vmem:[%s2738_s23 + $0x50] sm:$0xff]  ;;  %v424_v5 = vld [vmem:[%s2738_s23 + $0x58] sm:$0xff]  ;;  %v949_v7 = vadd.f32 %v948_v53, %v820_v4  ;;  %v2956_v6 = vadd.f32 %v421_v61, %v293_v37  ;;  %v929_v15 = vadd.f32 %v928_v62, %v802_v13 }
  0x95   : > { %v425_v8 = vld [vmem:[%s2738_s23 + $0x60] sm:$0xff]  ;;  %v426_v9 = vld [vmem:[%s2738_s23 + $0x68] sm:$0xff]  ;;  %v427_v10 = vld [vmem:[%s2738_s23 + $0x70] sm:$0xff]  ;;  %v2958_v11 = vadd.f32 %v422_v2, %v294_v38  ;;  %v2960_v14 = vadd.f32 %v423_v3, %v295_v39  ;;  %v953_v19 = vadd.f32 %v952_v1, %v823_v43  ;;  %v2963_v27 = vadd.f32 %v424_v5, %v296_v47 }
  0x96   : > { %v428_v25 = vld [vmem:[%s2738_s23 + $0x78] sm:$0xff]  ;;  %v2965_v4 = vadd.f32 %v425_v8, %v297_v48  ;;  %v325_v28 = vld [vmem:[%s2730_s10 + $0x140] sm:$0xff]  ;;  %v326_v29 = vld [vmem:[%s2730_s10 + $0x148] sm:$0xff]  ;;  %950 = vadd.xlane.f32.xlu1 %v949_v7  ;;  %v2969_v33 = vadd.f32 %v426_v9, %v298_v49  ;;  %v2971_v37 = vadd.f32 %v427_v10, %v299_v59  ;;  %677 = vst [vmem:[%s2781_s26 + $0x40] sm:$0xff] %v2956_v6 }
  0x97   : > { %4348 = vst [vmem:[#allocation16_spill] sm:$0xff] %v2958_v11  ;;  %4349 = vst [vmem:[#allocation17_spill] sm:$0xff] %v2960_v14  ;;  %v2973_v13 = vadd.f32 %v428_v25, %v300_v60  ;;  %v805_v38 = vmul.f32 %v2956_v6, %v2956_v6  ;;  %v327_v39 = vld [vmem:[%s2730_s10 + $0x150] sm:$0xff]  ;;  %v328_v40 = vld [vmem:[%s2730_s10 + $0x158] sm:$0xff]  ;;  %v930_v42 = vadd.f32 %v929_v15, %v803_v56 }
  0x98   : > { %4350 = vst [vmem:[#allocation18_spill] sm:$0xff] %v2963_v27  ;;  %4351 = vst [vmem:[#allocation19_spill] sm:$0xff] %v2965_v4  ;;  %v329_v41 = vld [vmem:[%s2730_s10 + $0x160] sm:$0xff]  ;;  %v954_v43 = vadd.f32 %v953_v19, %v824_v58  ;;  %v806_v47 = vmul.f32 %v2958_v11, %v2958_v11  ;;  %v807_v48 = vmul.f32 %v2960_v14, %v2960_v14  ;;  %v330_v49 = vld [vmem:[%s2730_s10 + $0x168] sm:$0xff] }
  0x99   : > { %4352 = vst [vmem:[#allocation20_spill] sm:$0xff] %v2969_v33  ;;  %4353 = vst [vmem:[#allocation21_spill] sm:$0xff] %v2971_v37  ;;  %v331_v53 = vld [vmem:[%s2730_s10 + $0x170] sm:$0xff]  ;;  %v332_v59 = vld [vmem:[%s2730_s10 + $0x178] sm:$0xff]  ;;  %v827_v56 = vmul.f32 %v2903_v35, %v2903_v35  ;;  %v828_v58 = vmul.f32 %v2905_v36, %v2905_v36  ;;  %v808_v60 = vmul.f32 %v2963_v27, %v2963_v27 }
  0x9a   : > { %4354 = vst [vmem:[#allocation22_spill] sm:$0xff] %v2973_v13  ;;  %678 = vst [vmem:[%s2781_s26 + $0x48] sm:$0xff] %v2958_v11  ;;  %v809_v61 = vmul.f32 %v2965_v4, %v2965_v4  ;;  %v453_v62 = vld [vmem:[%s2738_s23 + $0x140] sm:$0xff]  ;;  %v454_v1 = vld [vmem:[%s2738_s23 + $0x148] sm:$0xff]  ;;  %v931_v3 = vadd.f32 %v930_v42, %v804_v57  ;;  %v955_v5 = vadd.f32 %v954_v43, %v825_v63 }
  0x9b   : > { %679 = vst [vmem:[%s2781_s26 + $0x50] sm:$0xff] %v2960_v14  ;;  %680 = vst [vmem:[%s2781_s26 + $0x58] sm:$0xff] %v2963_v27  ;;  %v455_v2 = vld [vmem:[%s2738_s23 + $0x150] sm:$0xff]  ;;  %v3016_v7 = vmul.f32 %v2969_v33, %v2969_v33  ;;  %v934_v8 = vadd.f32 %v806_v47, %v805_v38  ;;  %v456_v9 = vld [vmem:[%s2738_s23 + $0x158] sm:$0xff]  ;;  %v3025_v27 = vadd.f32 %v454_v1, %v326_v29 }
  0x9c   : > { %681 = vst [vmem:[%s2781_s26 + $0x60] sm:$0xff] %v2965_v4  ;;  %682 = vst [vmem:[%s2781_s26 + $0x68] sm:$0xff] %v2969_v33  ;;  %v457_v10 = vld [vmem:[%s2738_s23 + $0x160] sm:$0xff]  ;;  %v458_v15 = vld [vmem:[%s2738_s23 + $0x168] sm:$0xff]  ;;  %v3023_v4 = vadd.f32 %v453_v62, %v325_v28  ;;  %v3027_v57 = vadd.f32 %v455_v2, %v327_v39  ;;  %v3029_v63 = vadd.f32 %v456_v9, %v328_v40  ;;  %932 = vadd.xlane.f32.xlu0 %v931_v3 }
  0x9d   : > { %683 = vst [vmem:[%s2781_s26 + $0x70] sm:$0xff] %v2971_v37  ;;  %684 = vst [vmem:[%s2781_s26 + $0x78] sm:$0xff] %v2973_v13  ;;  %v459_v19 = vld [vmem:[%s2738_s23 + $0x170] sm:$0xff]  ;;  %v460_v25 = vld [vmem:[%s2738_s23 + $0x178] sm:$0xff]  ;;  %v956_v42 = vadd.f32 %v955_v5, %v2948_v0  ;;  %v935_v43 = vadd.f32 %v934_v8, %v807_v48  ;;  %v3033_v47 = vadd.f32 %v457_v10, %v329_v41 }
  0x9e   : > { %4355 = vst [vmem:[#allocation23_spill] sm:$0xff] %v3023_v4  ;;  %4356 = vst [vmem:[#allocation24_spill] sm:$0xff] %v3025_v27  ;;  %v317_v38 = vld [vmem:[%s2730_s10 + $0x100] sm:$0xff]  ;;  %v3035_v28 = vadd.f32 %v458_v15, %v330_v49  ;;  %v318_v29 = vld [vmem:[%s2730_s10 + $0x108] sm:$0xff]  ;;  %v3040_v1 = vadd.f32 %v459_v19, %v331_v53  ;;  %v3042_v40 = vadd.f32 %v460_v25, %v332_v59 }
  0x9f   : > { %4357 = vst [vmem:[#allocation25_spill] sm:$0xff] %v3027_v57  ;;  %4358 = vst [vmem:[#allocation26_spill] sm:$0xff] %v3029_v63  ;;  %v319_v62 = vld [vmem:[%s2730_s10 + $0x110] sm:$0xff]  ;;  %v320_v39 = vld [vmem:[%s2730_s10 + $0x118] sm:$0xff]  ;;  %v837_v0 = vmul.f32 %v3023_v4, %v3023_v4  ;;  %v838_v41 = vmul.f32 %v3025_v27, %v3025_v27  ;;  %v957_v59 = vadd.f32 %v956_v42, %v827_v56 }
  0xa0   : > { %4359 = vst [vmem:[#allocation27_spill] sm:$0xff] %v3033_v47  ;;  %4360 = vst [vmem:[#allocation28_spill] sm:$0xff] %v3035_v28  ;;  %v321_v48 = vld [vmem:[%s2730_s10 + $0x120] sm:$0xff]  ;;  %v322_v49 = vld [vmem:[%s2730_s10 + $0x128] sm:$0xff]  ;;  %v811_v2 = vmul.f32 %v2971_v37, %v2971_v37  ;;  %v936_v3 = vadd.f32 %v935_v43, %v808_v60  ;;  %v839_v5 = vmul.f32 %v3027_v57, %v3027_v57 }
  0xa1   : > { %4361 = vst [vmem:[#allocation29_spill] sm:$0xff] %v3040_v1  ;;  %4362 = vst [vmem:[#allocation30_spill] sm:$0xff] %v3042_v40  ;;  %v323_v53 = vld [vmem:[%s2730_s10 + $0x130] sm:$0xff]  ;;  %v324_v8 = vld [vmem:[%s2730_s10 + $0x138] sm:$0xff]  ;;  %v812_v56 = vmul.f32 %v2973_v13, %v2973_v13  ;;  %v840_v60 = vmul.f32 %v3029_v63, %v3029_v63  ;;  %v841_v15 = vmul.f32 %v3033_v47, %v3033_v47 }
  0xa2   : > { %709 = vst [vmem:[%s2781_s26 + $0x140] sm:$0xff] %v3023_v4  ;;  %710 = vst [vmem:[%s2781_s26 + $0x148] sm:$0xff] %v3025_v27  ;;  %v445_v9 = vld [vmem:[%s2738_s23 + $0x100] sm:$0xff]  ;;  %v446_v10 = vld [vmem:[%s2738_s23 + $0x108] sm:$0xff]  ;;  %v3082_v19 = vmul.f32 %v3035_v28, %v3035_v28  ;;  %v937_v27 = vadd.f32 %v936_v3, %v809_v61  ;;  %v970_v4 = vadd.f32 %v838_v41, %v837_v0 }
  0xa3   : > { %711 = vst [vmem:[%s2781_s26 + $0x150] sm:$0xff] %v3027_v57  ;;  %712 = vst [vmem:[%s2781_s26 + $0x158] sm:$0xff] %v3029_v63  ;;  %v447_v25 = vld [vmem:[%s2738_s23 + $0x110] sm:$0xff]  ;;  %v448_v42 = vld [vmem:[%s2738_s23 + $0x118] sm:$0xff]  ;;  %v958_v57 = vadd.f32 %v957_v59, %v828_v58  ;;  %v3092_v33 = vadd.f32 %v446_v10, %v318_v29 }
  0xa4   : > { %713 = vst [vmem:[%s2781_s26 + $0x160] sm:$0xff] %v3033_v47  ;;  %714 = vst [vmem:[%s2781_s26 + $0x168] sm:$0xff] %v3035_v28  ;;  %v449_v43 = vld [vmem:[%s2738_s23 + $0x120] sm:$0xff]  ;;  %v450_v13 = vld [vmem:[%s2738_s23 + $0x128] sm:$0xff]  ;;  %v3090_v47 = vadd.f32 %v445_v9, %v317_v38  ;;  %v3094_v28 = vadd.f32 %v447_v25, %v319_v62  ;;  %v3096_v14 = vadd.f32 %v448_v42, %v320_v39 }
  0xa5   : > { %715 = vst [vmem:[%s2781_s26 + $0x170] sm:$0xff] %v3040_v1  ;;  %716 = vst [vmem:[%s2781_s26 + $0x178] sm:$0xff] %v3042_v40  ;;  %v451_v37 = vld [vmem:[%s2738_s23 + $0x130] sm:$0xff]  ;;  %v452_v63 = vld [vmem:[%s2738_s23 + $0x138] sm:$0xff]  ;;  %v3098_v58 = vadd.f32 %v449_v43, %v321_v48  ;;  %959 = vadd.xlane.f32.xlu1 %v958_v57  ;;  %v938_v41 = vadd.f32 %v937_v27, %v3016_v7  ;;  %v971_v38 = vadd.f32 %v970_v4, %v839_v5 }
  0xa6   : > { %4363 = vst [vmem:[#allocation31_spill] sm:$0xff] %v3090_v47  ;;  %4364 = vst [vmem:[#allocation32_spill] sm:$0xff] %v3092_v33  ;;  %v341_v61 = vld [vmem:[%s2730_s10 + $0x1c0] sm:$0xff]  ;;  %v342_v0 = vld [vmem:[%s2730_s10 + $0x1c8] sm:$0xff]  ;;  %v3103_v29 = vadd.f32 %v450_v13, %v322_v49  ;;  %v3105_v62 = vadd.f32 %v451_v37, %v323_v53  ;;  %v3112_v3 = vadd.f32 %v452_v63, %v324_v8 }
  0xa7   : > { %4365 = vst [vmem:[#allocation33_spill] sm:$0xff] %v3094_v28  ;;  %4366 = vst [vmem:[#allocation34_spill] sm:$0xff] %v3096_v14  ;;  %v343_v39 = vld [vmem:[%s2730_s10 + $0x1d0] sm:$0xff]  ;;  %v344_v48 = vld [vmem:[%s2730_s10 + $0x1d8] sm:$0xff]  ;;  %v829_v27 = vmul.f32 %v3090_v47, %v3090_v47  ;;  %v830_v4 = vmul.f32 %v3092_v33, %v3092_v33  ;;  %v831_v37 = vmul.f32 %v3094_v28, %v3094_v28 }
  0xa8   : > { %4367 = vst [vmem:[#allocation35_spill] sm:$0xff] %v3098_v58  ;;  %4368 = vst [vmem:[#allocation36_spill] sm:$0xff] %v3103_v29  ;;  %v345_v59 = vld [vmem:[%s2730_s10 + $0x1e0] sm:$0xff]  ;;  %v346_v13 = vld [vmem:[%s2730_s10 + $0x1e8] sm:$0xff]  ;;  %v939_v49 = vadd.f32 %v938_v41, %v811_v2  ;;  %v843_v53 = vmul.f32 %v3040_v1, %v3040_v1  ;;  %v3136_v5 = vmul.f32 %v3042_v40, %v3042_v40 }
  0xa9   : > { %4369 = vst [vmem:[#allocation37_spill] sm:$0xff] %v3105_v62  ;;  %701 = vst [vmem:[%s2781_s26 + $0x100] sm:$0xff] %v3090_v47  ;;  %v347_v7 = vld [vmem:[%s2730_s10 + $0x1f0] sm:$0xff]  ;;  %v348_v57 = vld [vmem:[%s2730_s10 + $0x1f8] sm:$0xff]  ;;  %v972_v8 = vadd.f32 %v971_v38, %v840_v60  ;;  %v832_v2 = vmul.f32 %v3096_v14, %v3096_v14  ;;  %v833_v42 = vmul.f32 %v3098_v58, %v3098_v58 }
  0xaa   : > { %4370 = vst [vmem:[#allocation38_spill] sm:$0xff] %v3112_v3  ;;  %702 = vst [vmem:[%s2781_s26 + $0x108] sm:$0xff] %v3092_v33  ;;  %v469_v63 = vld [vmem:[%s2738_s23 + $0x1c0] sm:$0xff]  ;;  %v470_v9 = vld [vmem:[%s2738_s23 + $0x1c8] sm:$0xff]  ;;  %v834_v60 = vmul.f32 %v3103_v29, %v3103_v29  ;;  %v961_v43 = vadd.f32 %v830_v4, %v829_v27  ;;  %v940_v33 = vadd.f32 %v939_v49, %v812_v56 }
  0xab   : > { %703 = vst [vmem:[%s2781_s26 + $0x110] sm:$0xff] %v3094_v28  ;;  %704 = vst [vmem:[%s2781_s26 + $0x118] sm:$0xff] %v3096_v14  ;;  %v471_v10 = vld [vmem:[%s2738_s23 + $0x1d0] sm:$0xff]  ;;  %v472_v25 = vld [vmem:[%s2738_s23 + $0x1d8] sm:$0xff]  ;;  %v973_v47 = vadd.f32 %v972_v8, %v841_v15  ;;  %v3157_v1 = vadd.f32 %v469_v63, %v341_v61  ;;  %v3159_v14 = vadd.f32 %v470_v9, %v342_v0 }
  0xac   : > { %705 = vst [vmem:[%s2781_s26 + $0x120] sm:$0xff] %v3098_v58  ;;  %706 = vst [vmem:[%s2781_s26 + $0x128] sm:$0xff] %v3103_v29  ;;  %v473_v41 = vld [vmem:[%s2738_s23 + $0x1e0] sm:$0xff]  ;;  %v474_v38 = vld [vmem:[%s2738_s23 + $0x1e8] sm:$0xff]  ;;  %v962_v58 = vadd.f32 %v961_v43, %v831_v37  ;;  %v3161_v11 = vadd.f32 %v471_v10, %v343_v39  ;;  %v3163_v27 = vadd.f32 %v472_v25, %v344_v48  ;;  %941 = vadd.xlane.f32.xlu0 %v940_v33 }
  0xad   : > { %707 = vst [vmem:[%s2781_s26 + $0x130] sm:$0xff] %v3105_v62  ;;  %708 = vst [vmem:[%s2781_s26 + $0x138] sm:$0xff] %v3112_v3  ;;  %v475_v28 = vld [vmem:[%s2738_s23 + $0x1f0] sm:$0xff]  ;;  %v476_v40 = vld [vmem:[%s2738_s23 + $0x1f8] sm:$0xff]  ;;  %v3165_v4 = vadd.f32 %v473_v41, %v345_v59  ;;  %v974_v61 = vadd.f32 %v973_v47, %v3082_v19  ;;  %v3170_v63 = vadd.f32 %v474_v38, %v346_v13 }
  0xae   : > { %4371 = vst [vmem:[#allocation39_spill] sm:$0xff] %v3157_v1  ;;  %4372 = vst [vmem:[#allocation40_spill] sm:$0xff] %v3159_v14  ;;  %v333_v56 = vld [vmem:[%s2730_s10 + $0x180] sm:$0xff]  ;;  %v334_v15 = vld [vmem:[%s2730_s10 + $0x188] sm:$0xff]  ;;  %v3172_v0 = vadd.f32 %v475_v28, %v347_v7  ;;  %v3174_v39 = vadd.f32 %v476_v40, %v348_v57  ;;  %v963_v47 = vadd.f32 %v962_v58, %v832_v2 }
  0xaf   : > { %4373 = vst [vmem:[#allocation41_spill] sm:$0xff] %v3161_v11  ;;  %4374 = vst [vmem:[#allocation42_spill] sm:$0xff] %v3163_v27  ;;  %v335_v48 = vld [vmem:[%s2730_s10 + $0x190] sm:$0xff]  ;;  %v336_v59 = vld [vmem:[%s2730_s10 + $0x198] sm:$0xff]  ;;  %v853_v28 = vmul.f32 %v3157_v1, %v3157_v1  ;;  %v854_v40 = vmul.f32 %v3159_v14, %v3159_v14  ;;  %v855_v19 = vmul.f32 %v3161_v11, %v3161_v11 }
  0xb0   : > { %4375 = vst [vmem:[#allocation43_spill] sm:$0xff] %v3165_v4  ;;  %4376 = vst [vmem:[#allocation44_spill] sm:$0xff] %v3170_v63  ;;  %v337_v33 = vld [vmem:[%s2730_s10 + $0x1a0] sm:$0xff]  ;;  %v338_v58 = vld [vmem:[%s2730_s10 + $0x1a8] sm:$0xff]  ;;  %v975_v49 = vadd.f32 %v974_v61, %v843_v53  ;;  %v835_v8 = vmul.f32 %v3105_v62, %v3105_v62  ;;  %v836_v9 = vmul.f32 %v3112_v3, %v3112_v3 }
  0xb1   : > { %4377 = vst [vmem:[#allocation45_spill] sm:$0xff] %v3172_v0  ;;  %4378 = vst [vmem:[#allocation46_spill] sm:$0xff] %v3174_v39  ;;  %v339_v37 = vld [vmem:[%s2730_s10 + $0x1b0] sm:$0xff]  ;;  %v461_v13 = vld [vmem:[%s2738_s23 + $0x180] sm:$0xff]  ;;  %v856_v10 = vmul.f32 %v3163_v27, %v3163_v27  ;;  %v964_v53 = vadd.f32 %v963_v47, %v833_v42  ;;  %v857_v41 = vmul.f32 %v3165_v4, %v3165_v4 }
  0xb2   : > { %725 = vst [vmem:[%s2781_s26 + $0x1c0] sm:$0xff] %v3157_v1  ;;  %726 = vst [vmem:[%s2781_s26 + $0x1c8] sm:$0xff] %v3159_v14  ;;  %v462_v7 = vld [vmem:[%s2738_s23 + $0x188] sm:$0xff]  ;;  %v463_v57 = vld [vmem:[%s2738_s23 + $0x190] sm:$0xff]  ;;  %v858_v38 = vmul.f32 %v3170_v63, %v3170_v63  ;;  %v988_v61 = vadd.f32 %v854_v40, %v853_v28  ;;  %v3223_v3 = vadd.f32 %v461_v13, %v333_v56 }
  0xb3   : > { %727 = vst [vmem:[%s2781_s26 + $0x1d0] sm:$0xff] %v3161_v11  ;;  %728 = vst [vmem:[%s2781_s26 + $0x1d8] sm:$0xff] %v3163_v27  ;;  %v340_v25 = vld [vmem:[%s2730_s10 + $0x1b8] sm:$0xff]  ;;  %v465_v43 = vld [vmem:[%s2738_s23 + $0x1a0] sm:$0xff]  ;;  %v976_v27 = vadd.f32 %v975_v49, %v3136_v5  ;;  %v3225_v42 = vadd.f32 %v462_v7, %v334_v15  ;;  %v3227_v47 = vadd.f32 %v463_v57, %v335_v48 }
  0xb4   : > { %729 = vst [vmem:[%s2781_s26 + $0x1e0] sm:$0xff] %v3165_v4  ;;  %730 = vst [vmem:[%s2781_s26 + $0x1e8] sm:$0xff] %v3170_v63  ;;  %v464_v2 = vld [vmem:[%s2738_s23 + $0x198] sm:$0xff]  ;;  %v466_v11 = vld [vmem:[%s2738_s23 + $0x1a8] sm:$0xff]  ;;  %v965_v4 = vadd.f32 %v964_v53, %v834_v60  ;;  %v989_v62 = vadd.f32 %v988_v61, %v855_v19  ;;  %v3231_v28 = vadd.f32 %v465_v43, %v337_v33 }
  0xb5   : > { %731 = vst [vmem:[%s2781_s26 + $0x1f0] sm:$0xff] %v3172_v0  ;;  %732 = vst [vmem:[%s2781_s26 + $0x1f8] sm:$0xff] %v3174_v39  ;;  %v467_v14 = vld [vmem:[%s2738_s23 + $0x1b0] sm:$0xff]  ;;  %v468_v1 = vld [vmem:[%s2738_s23 + $0x1b8] sm:$0xff]  ;;  %v3229_v63 = vadd.f32 %v464_v2, %v336_v59  ;;  %977 = vadd.xlane.f32.xlu1 %v976_v27  ;;  %v3237_v15 = vadd.f32 %v466_v11, %v338_v58  ;;  %v845_v59 = vmul.f32 %v3223_v3, %v3223_v3 }
  0xb6   : > { %4379 = vst [vmem:[#allocation47_spill] sm:$0xff] %v3223_v3  ;;  %4380 = vst [vmem:[#allocation48_spill] sm:$0xff] %v3225_v42  ;;  %v357_v40 = vld [vmem:[%s2730_s10 + $0x240] sm:$0xff]  ;;  %v358_v5 = vld [vmem:[%s2730_s10 + $0x248] sm:$0xff]  ;;  %v3239_v48 = vadd.f32 %v467_v14, %v339_v37  ;;  %v3241_v60 = vadd.f32 %v468_v1, %v340_v25  ;;  %v966_v33 = vadd.f32 %v965_v4, %v835_v8 }
  0xb7   : > { %4381 = vst [vmem:[#allocation49_spill] sm:$0xff] %v3227_v47  ;;  %4382 = vst [vmem:[#allocation50_spill] sm:$0xff] %v3229_v63  ;;  %v359_v56 = vld [vmem:[%s2730_s10 + $0x250] sm:$0xff]  ;;  %v360_v13 = vld [vmem:[%s2730_s10 + $0x258] sm:$0xff]  ;;  %v990_v1 = vadd.f32 %v989_v62, %v856_v10  ;;  %v846_v19 = vmul.f32 %v3225_v42, %v3225_v42  ;;  %v847_v58 = vmul.f32 %v3227_v47, %v3227_v47 }
  0xb8   : > { %4383 = vst [vmem:[#allocation51_spill] sm:$0xff] %v3231_v28  ;;  %4384 = vst [vmem:[#allocation52_spill] sm:$0xff] %v3237_v15  ;;  %v361_v11 = vld [vmem:[%s2730_s10 + $0x260] sm:$0xff]  ;;  %v362_v27 = vld [vmem:[%s2730_s10 + $0x268] sm:$0xff]  ;;  %v859_v62 = vmul.f32 %v3172_v0, %v3172_v0  ;;  %v860_v4 = vmul.f32 %v3174_v39, %v3174_v39  ;;  %v848_v49 = vmul.f32 %v3229_v63, %v3229_v63 }
  0xb9   : > { %4385 = vst [vmem:[#allocation53_spill] sm:$0xff] %v3239_v48  ;;  %4386 = vst [vmem:[#allocation54_spill] sm:$0xff] %v3241_v60  ;;  %v485_v14 = vld [vmem:[%s2738_s23 + $0x240] sm:$0xff]  ;;  %v486_v37 = vld [vmem:[%s2738_s23 + $0x248] sm:$0xff]  ;;  %v849_v8 = vmul.f32 %v3231_v28, %v3231_v28  ;;  %v967_v43 = vadd.f32 %v966_v33, %v836_v9  ;;  %v991_v53 = vadd.f32 %v990_v1, %v857_v41 }
  0xba   : > { %717 = vst [vmem:[%s2781_s26 + $0x180] sm:$0xff] %v3223_v3  ;;  %718 = vst [vmem:[%s2781_s26 + $0x188] sm:$0xff] %v3225_v42  ;;  %v487_v7 = vld [vmem:[%s2738_s23 + $0x250] sm:$0xff]  ;;  %v488_v57 = vld [vmem:[%s2738_s23 + $0x258] sm:$0xff]  ;;  %v850_v61 = vmul.f32 %v3237_v15, %v3237_v15  ;;  %v3287_v39 = vadd.f32 %v485_v14, %v357_v40 }
  0xbb   : > { %719 = vst [vmem:[%s2781_s26 + $0x190] sm:$0xff] %v3227_v47  ;;  %720 = vst [vmem:[%s2781_s26 + $0x198] sm:$0xff] %v3229_v63  ;;  %v363_v10 = vld [vmem:[%s2730_s10 + $0x270] sm:$0xff]  ;;  %v489_v25 = vld [vmem:[%s2738_s23 + $0x260] sm:$0xff]  ;;  %v979_v47 = vadd.f32 %v846_v19, %v845_v59  ;;  %v3291_v0 = vadd.f32 %v487_v7, %v359_v56  ;;  %v3293_v9 = vadd.f32 %v488_v57, %v360_v13  ;;  %968 = vadd.xlane.f32.xlu0 %v967_v43 }
  0xbc   : > { %721 = vst [vmem:[%s2781_s26 + $0x1a0] sm:$0xff] %v3231_v28  ;;  %722 = vst [vmem:[%s2781_s26 + $0x1a8] sm:$0xff] %v3237_v15  ;;  %v490_v2 = vld [vmem:[%s2738_s23 + $0x268] sm:$0xff]  ;;  %v364_v42 = vld [vmem:[%s2730_s10 + $0x278] sm:$0xff]  ;;  %v3289_v28 = vadd.f32 %v486_v37, %v358_v5  ;;  %v992_v59 = vadd.f32 %v991_v53, %v858_v38  ;;  %v3296_v1 = vadd.f32 %v489_v25, %v361_v11 }
  0xbd   : > { %723 = vst [vmem:[%s2781_s26 + $0x1b0] sm:$0xff] %v3239_v48  ;;  %724 = vst [vmem:[%s2781_s26 + $0x1b8] sm:$0xff] %v3241_v60  ;;  %v491_v3 = vld [vmem:[%s2738_s23 + $0x270] sm:$0xff]  ;;  %v492_v63 = vld [vmem:[%s2738_s23 + $0x278] sm:$0xff]  ;;  %v980_v33 = vadd.f32 %v979_v47, %v847_v58  ;;  %v3298_v40 = vadd.f32 %v490_v2, %v362_v27  ;;  %v869_v38 = vmul.f32 %v3287_v39, %v3287_v39 }
  0xbe   : > { %4387 = vst [vmem:[#allocation55_spill] sm:$0xff] %v3287_v39  ;;  %4388 = vst [vmem:[#allocation56_spill] sm:$0xff] %v3289_v28  ;;  %v349_v41 = vld [vmem:[%s2730_s10 + $0x200] sm:$0xff]  ;;  %v350_v5 = vld [vmem:[%s2730_s10 + $0x208] sm:$0xff]  ;;  %v3304_v13 = vadd.f32 %v491_v3, %v363_v10  ;;  %v3306_v37 = vadd.f32 %v492_v63, %v364_v42  ;;  %v870_v3 = vmul.f32 %v3289_v28, %v3289_v28 }
  0xbf   : > { %4389 = vst [vmem:[#allocation57_spill] sm:$0xff] %v3291_v0  ;;  %4390 = vst [vmem:[#allocation58_spill] sm:$0xff] %v3293_v9  ;;  %v351_v14 = vld [vmem:[%s2730_s10 + $0x210] sm:$0xff]  ;;  %v352_v19 = vld [vmem:[%s2730_s10 + $0x218] sm:$0xff]  ;;  %v993_v11 = vadd.f32 %v992_v59, %v859_v62  ;;  %v851_v27 = vmul.f32 %v3239_v48, %v3239_v48  ;;  %v981_v58 = vadd.f32 %v980_v33, %v848_v49 }
  0xc0   : > { %4391 = vst [vmem:[#allocation59_spill] sm:$0xff] %v3296_v1  ;;  %4392 = vst [vmem:[#allocation60_spill] sm:$0xff] %v3298_v40  ;;  %v353_v56 = vld [vmem:[%s2730_s10 + $0x220] sm:$0xff]  ;;  %v354_v63 = vld [vmem:[%s2730_s10 + $0x228] sm:$0xff]  ;;  %v871_v7 = vmul.f32 %v3291_v0, %v3291_v0  ;;  %v852_v62 = vmul.f32 %v3241_v60, %v3241_v60  ;;  %v872_v49 = vmul.f32 %v3293_v9, %v3293_v9 }
  0xc1   : > { %4393 = vst [vmem:[#allocation61_spill] sm:$0xff] %v3304_v13  ;;  %4394 = vst [vmem:[#allocation62_spill] sm:$0xff] %v3306_v37  ;;  %v477_v42 = vld [vmem:[%s2738_s23 + $0x200] sm:$0xff]  ;;  %v478_v47 = vld [vmem:[%s2738_s23 + $0x208] sm:$0xff]  ;;  %v873_v2 = vmul.f32 %v3296_v1, %v3296_v1  ;;  %v3346_v43 = vmul.f32 %v3298_v40, %v3298_v40 }
  0xc2   : > { %741 = vst [vmem:[%s2781_s26 + $0x240] sm:$0xff] %v3287_v39  ;;  %742 = vst [vmem:[%s2781_s26 + $0x248] sm:$0xff] %v3289_v28  ;;  %v479_v57 = vld [vmem:[%s2738_s23 + $0x210] sm:$0xff]  ;;  %v480_v10 = vld [vmem:[%s2738_s23 + $0x218] sm:$0xff]  ;;  %v982_v28 = vadd.f32 %v981_v58, %v849_v8  ;;  %v1006_v39 = vadd.f32 %v870_v3, %v869_v38  ;;  %v3353_v48 = vadd.f32 %v477_v42, %v349_v41 }
  0xc3   : > { %743 = vst [vmem:[%s2781_s26 + $0x250] sm:$0xff] %v3291_v0  ;;  %744 = vst [vmem:[%s2781_s26 + $0x258] sm:$0xff] %v3293_v9  ;;  %v481_v25 = vld [vmem:[%s2738_s23 + $0x220] sm:$0xff]  ;;  %v355_v53 = vld [vmem:[%s2730_s10 + $0x230] sm:$0xff]  ;;  %v994_v0 = vadd.f32 %v993_v11, %v860_v4  ;;  %v3357_v15 = vadd.f32 %v479_v57, %v351_v14  ;;  %v3399_v57 = vmul.f32 %v3306_v37, %v3306_v37 }
  0xc4   : > { %745 = vst [vmem:[%s2781_s26 + $0x260] sm:$0xff] %v3296_v1  ;;  %746 = vst [vmem:[%s2781_s26 + $0x268] sm:$0xff] %v3298_v40  ;;  %v482_v59 = vld [vmem:[%s2738_s23 + $0x228] sm:$0xff]  ;;  %v483_v33 = vld [vmem:[%s2738_s23 + $0x230] sm:$0xff]  ;;  %v3355_v1 = vadd.f32 %v478_v47, %v350_v5  ;;  %v3359_v40 = vadd.f32 %v480_v10, %v352_v19  ;;  %v3361_v4 = vadd.f32 %v481_v25, %v353_v56 }
  0xc5   : > { %747 = vst [vmem:[%s2781_s26 + $0x270] sm:$0xff] %v3304_v13  ;;  %748 = vst [vmem:[%s2781_s26 + $0x278] sm:$0xff] %v3306_v37  ;;  %v356_v60 = vld [vmem:[%s2730_s10 + $0x238] sm:$0xff]  ;;  %v373_v8 = vld [vmem:[%s2730_s10 + $0x2c0] sm:$0xff]  ;;  %995 = vadd.xlane.f32.xlu1 %v994_v0  ;;  %v983_v3 = vadd.f32 %v982_v28, %v850_v61  ;;  %v1007_v11 = vadd.f32 %v1006_v39, %v871_v7  ;;  %v3365_v41 = vadd.f32 %v482_v59, %v354_v63 }
  0xc6   : > { %v484_v9 = vld [vmem:[%s2738_s23 + $0x238] sm:$0xff]  ;;  %4395 = vst [vmem:[#allocation63_spill] sm:$0xff] %v3353_v48  ;;  %4396 = vst [vmem:[#allocation64_spill] sm:$0xff] %v3355_v1  ;;  %v374_v38 = vld [vmem:[%s2730_s10 + $0x2c8] sm:$0xff]  ;;  %v3367_v5 = vadd.f32 %v483_v33, %v355_v53  ;;  %v861_v0 = vmul.f32 %v3353_v48, %v3353_v48  ;;  %v862_v39 = vmul.f32 %v3355_v1, %v3355_v1 }
  0xc7   : > { %4397 = vst [vmem:[#allocation65_spill] sm:$0xff] %v3357_v15  ;;  %4398 = vst [vmem:[#allocation66_spill] sm:$0xff] %v3359_v40  ;;  %v375_v14 = vld [vmem:[%s2730_s10 + $0x2d0] sm:$0xff]  ;;  %v376_v19 = vld [vmem:[%s2730_s10 + $0x2d8] sm:$0xff]  ;;  %v3374_v42 = vadd.f32 %v484_v9, %v356_v60  ;;  %v863_v28 = vmul.f32 %v3357_v15, %v3357_v15  ;;  %v984_v58 = vadd.f32 %v983_v3, %v851_v27 }
  0xc8   : > { %4399 = vst [vmem:[#allocation67_spill] sm:$0xff] %v3361_v4  ;;  %4400 = vst [vmem:[#allocation68_spill] sm:$0xff] %v3365_v41  ;;  %v377_v56 = vld [vmem:[%s2730_s10 + $0x2e0] sm:$0xff]  ;;  %v378_v60 = vld [vmem:[%s2730_s10 + $0x2e8] sm:$0xff]  ;;  %v875_v7 = vmul.f32 %v3304_v13, %v3304_v13  ;;  %v1008_v10 = vadd.f32 %v1007_v11, %v872_v49  ;;  %v864_v27 = vmul.f32 %v3359_v40, %v3359_v40 }
  0xc9   : > { %4401 = vst [vmem:[#allocation69_spill] sm:$0xff] %v3367_v5  ;;  %733 = vst [vmem:[%s2781_s26 + $0x200] sm:$0xff] %v3353_v48  ;;  %v379_v61 = vld [vmem:[%s2730_s10 + $0x2f0] sm:$0xff]  ;;  %v380_v9 = vld [vmem:[%s2730_s10 + $0x2f8] sm:$0xff]  ;;  %v865_v33 = vmul.f32 %v3361_v4, %v3361_v4  ;;  %v866_v49 = vmul.f32 %v3365_v41, %v3365_v41  ;;  %v997_v3 = vadd.f32 %v862_v39, %v861_v0 }
  0xca   : > { %4402 = vst [vmem:[#allocation70_spill] sm:$0xff] %v3374_v42  ;;  %734 = vst [vmem:[%s2781_s26 + $0x208] sm:$0xff] %v3355_v1  ;;  %v501_v63 = vld [vmem:[%s2738_s23 + $0x2c0] sm:$0xff]  ;;  %v502_v47 = vld [vmem:[%s2738_s23 + $0x2c8] sm:$0xff]  ;;  %v985_v48 = vadd.f32 %v984_v58, %v852_v62  ;;  %v1009_v37 = vadd.f32 %v1008_v10, %v873_v2  ;;  %v868_v58 = vmul.f32 %v3374_v42, %v3374_v42 }
  0xcb   : > { %735 = vst [vmem:[%s2781_s26 + $0x210] sm:$0xff] %v3357_v15  ;;  %736 = vst [vmem:[%s2781_s26 + $0x218] sm:$0xff] %v3359_v40  ;;  %v503_v25 = vld [vmem:[%s2738_s23 + $0x2d0] sm:$0xff]  ;;  %v504_v53 = vld [vmem:[%s2738_s23 + $0x2d8] sm:$0xff]  ;;  %v3419_v13 = vadd.f32 %v501_v63, %v373_v8  ;;  %v3421_v40 = vadd.f32 %v502_v47, %v374_v38  ;;  %v998_v29 = vadd.f32 %v997_v3, %v863_v28 }
  0xcc   : > { %737 = vst [vmem:[%s2781_s26 + $0x220] sm:$0xff] %v3361_v4  ;;  %738 = vst [vmem:[%s2781_s26 + $0x228] sm:$0xff] %v3365_v41  ;;  %v505_v59 = vld [vmem:[%s2738_s23 + $0x2e0] sm:$0xff]  ;;  %v506_v11 = vld [vmem:[%s2738_s23 + $0x2e8] sm:$0xff]  ;;  %v3423_v4 = vadd.f32 %v503_v25, %v375_v14  ;;  %v3425_v41 = vadd.f32 %v504_v53, %v376_v19  ;;  %986 = vadd.xlane.f32.xlu0 %v985_v48  ;;  %v1010_v2 = vadd.f32 %v1009_v37, %v3346_v43 }
  0xcd   : > { %739 = vst [vmem:[%s2781_s26 + $0x230] sm:$0xff] %v3367_v5  ;;  %740 = vst [vmem:[%s2781_s26 + $0x238] sm:$0xff] %v3374_v42  ;;  %v507_v15 = vld [vmem:[%s2738_s23 + $0x2f0] sm:$0xff]  ;;  %v508_v1 = vld [vmem:[%s2738_s23 + $0x2f8] sm:$0xff]  ;;  %v3427_v0 = vadd.f32 %v505_v59, %v377_v56  ;;  %v3432_v8 = vadd.f32 %v506_v11, %v378_v60  ;;  %v999_v37 = vadd.f32 %v998_v29, %v864_v27 }
  0xce   : > { %4403 = vst [vmem:[#allocation71_spill] sm:$0xff] %v3419_v13  ;;  %4404 = vst [vmem:[#allocation72_spill] sm:$0xff] %v3421_v40  ;;  %v365_v62 = vld [vmem:[%s2730_s10 + $0x280] sm:$0xff]  ;;  %v366_v39 = vld [vmem:[%s2730_s10 + $0x288] sm:$0xff]  ;;  %v3434_v38 = vadd.f32 %v507_v15, %v379_v61  ;;  %v3436_v14 = vadd.f32 %v508_v1, %v380_v9  ;;  %v885_v15 = vmul.f32 %v3419_v13, %v3419_v13 }
  0xcf   : > { %4405 = vst [vmem:[#allocation73_spill] sm:$0xff] %v3423_v4  ;;  %4406 = vst [vmem:[#allocation74_spill] sm:$0xff] %v3425_v41  ;;  %v367_v19 = vld [vmem:[%s2730_s10 + $0x290] sm:$0xff]  ;;  %v368_v56 = vld [vmem:[%s2730_s10 + $0x298] sm:$0xff]  ;;  %v886_v1 = vmul.f32 %v3421_v40, %v3421_v40  ;;  %v887_v29 = vmul.f32 %v3423_v4, %v3423_v4  ;;  %v1011_v63 = vadd.f32 %v1010_v2, %v875_v7 }
  0xd0   : > { %4407 = vst [vmem:[#allocation75_spill] sm:$0xff] %v3427_v0  ;;  %4408 = vst [vmem:[#allocation76_spill] sm:$0xff] %v3432_v8  ;;  %v369_v48 = vld [vmem:[%s2730_s10 + $0x2a0] sm:$0xff]  ;;  %v370_v43 = vld [vmem:[%s2730_s10 + $0x2a8] sm:$0xff]  ;;  %v867_v47 = vmul.f32 %v3367_v5, %v3367_v5  ;;  %v888_v10 = vmul.f32 %v3425_v41, %v3425_v41  ;;  %v1000_v7 = vadd.f32 %v999_v37, %v865_v33 }
  0xd1   : > { %4409 = vst [vmem:[#allocation77_spill] sm:$0xff] %v3434_v38  ;;  %4410 = vst [vmem:[#allocation78_spill] sm:$0xff] %v3436_v14  ;;  %v371_v28 = vld [vmem:[%s2730_s10 + $0x2b0] sm:$0xff]  ;;  %v493_v60 = vld [vmem:[%s2738_s23 + $0x280] sm:$0xff]  ;;  %v889_v27 = vmul.f32 %v3427_v0, %v3427_v0  ;;  %v890_v3 = vmul.f32 %v3432_v8, %v3432_v8  ;;  %v1024_v11 = vadd.f32 %v886_v1, %v885_v15 }
  0xd2   : > { %757 = vst [vmem:[%s2781_s26 + $0x2c0] sm:$0xff] %v3419_v13  ;;  %758 = vst [vmem:[%s2781_s26 + $0x2c8] sm:$0xff] %v3421_v40  ;;  %v494_v61 = vld [vmem:[%s2738_s23 + $0x288] sm:$0xff]  ;;  %v495_v9 = vld [vmem:[%s2738_s23 + $0x290] sm:$0xff]  ;;  %v3485_v13 = vadd.f32 %v493_v60, %v365_v62 }
  0xd3   : > { %759 = vst [vmem:[%s2781_s26 + $0x2d0] sm:$0xff] %v3423_v4  ;;  %760 = vst [vmem:[%s2781_s26 + $0x2d8] sm:$0xff] %v3425_v41  ;;  %v372_v25 = vld [vmem:[%s2730_s10 + $0x2b8] sm:$0xff]  ;;  %v497_v59 = vld [vmem:[%s2738_s23 + $0x2a0] sm:$0xff]  ;;  %v1012_v41 = vadd.f32 %v1011_v63, %v3399_v57  ;;  %v3487_v33 = vadd.f32 %v494_v61, %v366_v39  ;;  %v3489_v37 = vadd.f32 %v495_v9, %v367_v19 }
  0xd4   : > { %761 = vst [vmem:[%s2781_s26 + $0x2e0] sm:$0xff] %v3427_v0  ;;  %762 = vst [vmem:[%s2781_s26 + $0x2e8] sm:$0xff] %v3432_v8  ;;  %v496_v53 = vld [vmem:[%s2738_s23 + $0x298] sm:$0xff]  ;;  %v498_v2 = vld [vmem:[%s2738_s23 + $0x2a8] sm:$0xff]  ;;  %v1001_v0 = vadd.f32 %v1000_v7, %v866_v49  ;;  %v1025_v42 = vadd.f32 %v1024_v11, %v887_v29  ;;  %v3493_v15 = vadd.f32 %v497_v59, %v369_v48 }
  0xd5   : > { %763 = vst [vmem:[%s2781_s26 + $0x2f0] sm:$0xff] %v3434_v38  ;;  %764 = vst [vmem:[%s2781_s26 + $0x2f8] sm:$0xff] %v3436_v14  ;;  %v499_v4 = vld [vmem:[%s2738_s23 + $0x2b0] sm:$0xff]  ;;  %v500_v40 = vld [vmem:[%s2738_s23 + $0x2b8] sm:$0xff]  ;;  %v3491_v8 = vadd.f32 %v496_v53, %v368_v56  ;;  %1013 = vadd.xlane.f32.xlu1 %v1012_v41  ;;  %v3499_v39 = vadd.f32 %v498_v2, %v370_v43  ;;  %v877_v56 = vmul.f32 %v3485_v13, %v3485_v13 }
  0xd6   : > { %4411 = vst [vmem:[#allocation79_spill] sm:$0xff] %v3485_v13  ;;  %4412 = vst [vmem:[#allocation80_spill] sm:$0xff] %v3487_v33  ;;  %v389_v1 = vld [vmem:[%s2730_s10 + $0x340] sm:$0xff]  ;;  %v390_v57 = vld [vmem:[%s2730_s10 + $0x348] sm:$0xff]  ;;  %v3501_v19 = vadd.f32 %v499_v4, %v371_v28  ;;  %v3503_v49 = vadd.f32 %v500_v40, %v372_v25  ;;  %v1002_v29 = vadd.f32 %v1001_v0, %v867_v47 }
  0xd7   : > { %4413 = vst [vmem:[#allocation81_spill] sm:$0xff] %v3489_v37  ;;  %4414 = vst [vmem:[#allocation82_spill] sm:$0xff] %v3491_v8  ;;  %v391_v62 = vld [vmem:[%s2730_s10 + $0x350] sm:$0xff]  ;;  %v392_v60 = vld [vmem:[%s2730_s10 + $0x358] sm:$0xff]  ;;  %v1026_v40 = vadd.f32 %v1025_v42, %v888_v10  ;;  %v878_v43 = vmul.f32 %v3487_v33, %v3487_v33  ;;  %v879_v28 = vmul.f32 %v3489_v37, %v3489_v37 }
  0xd8   : > { %4415 = vst [vmem:[#allocation83_spill] sm:$0xff] %v3493_v15  ;;  %4416 = vst [vmem:[#allocation84_spill] sm:$0xff] %v3499_v39  ;;  %v393_v41 = vld [vmem:[%s2730_s10 + $0x360] sm:$0xff]  ;;  %v394_v48 = vld [vmem:[%s2730_s10 + $0x368] sm:$0xff]  ;;  %v891_v42 = vmul.f32 %v3434_v38, %v3434_v38  ;;  %v892_v0 = vmul.f32 %v3436_v14, %v3436_v14  ;;  %v880_v47 = vmul.f32 %v3491_v8, %v3491_v8 }
  0xd9   : > { %4417 = vst [vmem:[#allocation85_spill] sm:$0xff] %v3501_v19  ;;  %4418 = vst [vmem:[#allocation86_spill] sm:$0xff] %v3503_v49  ;;  %v517_v4 = vld [vmem:[%s2738_s23 + $0x340] sm:$0xff]  ;;  %v518_v61 = vld [vmem:[%s2738_s23 + $0x348] sm:$0xff]  ;;  %v881_v10 = vmul.f32 %v3493_v15, %v3493_v15  ;;  %v1003_v7 = vadd.f32 %v1002_v29, %v868_v58  ;;  %v1027_v11 = vadd.f32 %v1026_v40, %v889_v27 }
  0xda   : > { %749 = vst [vmem:[%s2781_s26 + $0x280] sm:$0xff] %v3485_v13  ;;  %750 = vst [vmem:[%s2781_s26 + $0x288] sm:$0xff] %v3487_v33  ;;  %v519_v9 = vld [vmem:[%s2738_s23 + $0x350] sm:$0xff]  ;;  %v520_v63 = vld [vmem:[%s2738_s23 + $0x358] sm:$0xff]  ;;  %v882_v2 = vmul.f32 %v3499_v39, %v3499_v39  ;;  %v3549_v14 = vadd.f32 %v517_v4, %v389_v1 }
  0xdb   : > { %751 = vst [vmem:[%s2781_s26 + $0x290] sm:$0xff] %v3489_v37  ;;  %752 = vst [vmem:[%s2781_s26 + $0x298] sm:$0xff] %v3491_v8  ;;  %v395_v25 = vld [vmem:[%s2730_s10 + $0x370] sm:$0xff]  ;;  %v521_v53 = vld [vmem:[%s2738_s23 + $0x360] sm:$0xff]  ;;  %v1015_v37 = vadd.f32 %v878_v43, %v877_v56  ;;  %v3553_v38 = vadd.f32 %v519_v9, %v391_v62  ;;  %v3555_v58 = vadd.f32 %v520_v63, %v392_v60  ;;  %1004 = vadd.xlane.f32.xlu0 %v1003_v7 }
  0xdc   : > { %753 = vst [vmem:[%s2781_s26 + $0x2a0] sm:$0xff] %v3493_v15  ;;  %754 = vst [vmem:[%s2781_s26 + $0x2a8] sm:$0xff] %v3499_v39  ;;  %v522_v59 = vld [vmem:[%s2738_s23 + $0x368] sm:$0xff]  ;;  %v396_v33 = vld [vmem:[%s2730_s10 + $0x378] sm:$0xff]  ;;  %v3551_v15 = vadd.f32 %v518_v61, %v390_v57  ;;  %v1028_v56 = vadd.f32 %v1027_v11, %v890_v3  ;;  %v3558_v40 = vadd.f32 %v521_v53, %v393_v41 }
  0xdd   : > { %755 = vst [vmem:[%s2781_s26 + $0x2b0] sm:$0xff] %v3501_v19  ;;  %756 = vst [vmem:[%s2781_s26 + $0x2b8] sm:$0xff] %v3503_v49  ;;  %v523_v13 = vld [vmem:[%s2738_s23 + $0x370] sm:$0xff]  ;;  %v524_v8 = vld [vmem:[%s2738_s23 + $0x378] sm:$0xff]  ;;  %v1016_v29 = vadd.f32 %v1015_v37, %v879_v28  ;;  %v3560_v1 = vadd.f32 %v522_v59, %v394_v48  ;;  %v901_v3 = vmul.f32 %v3549_v14, %v3549_v14 }
  0xde   : > { %4419 = vst [vmem:[#allocation87_spill] sm:$0xff] %v3549_v14  ;;  %4420 = vst [vmem:[#allocation88_spill] sm:$0xff] %v3551_v15  ;;  %v381_v27 = vld [vmem:[%s2730_s10 + $0x300] sm:$0xff]  ;;  %v382_v57 = vld [vmem:[%s2730_s10 + $0x308] sm:$0xff]  ;;  %v3566_v60 = vadd.f32 %v523_v13, %v395_v25  ;;  %v3568_v61 = vadd.f32 %v524_v8, %v396_v33  ;;  %v902_v13 = vmul.f32 %v3551_v15, %v3551_v15 }
  0xdf   : > { %4421 = vst [vmem:[#allocation89_spill] sm:$0xff] %v3553_v38  ;;  %4422 = vst [vmem:[#allocation90_spill] sm:$0xff] %v3555_v58  ;;  %v383_v4 = vld [vmem:[%s2730_s10 + $0x310] sm:$0xff]  ;;  %v384_v43 = vld [vmem:[%s2730_s10 + $0x318] sm:$0xff]  ;;  %v1029_v41 = vadd.f32 %v1028_v56, %v891_v42  ;;  %v883_v48 = vmul.f32 %v3501_v19, %v3501_v19  ;;  %v1017_v28 = vadd.f32 %v1016_v29, %v880_v47 }
  0xe0   : > { %4423 = vst [vmem:[#allocation91_spill] sm:$0xff] %v3558_v40  ;;  %4424 = vst [vmem:[#allocation92_spill] sm:$0xff] %v3560_v1  ;;  %v385_v62 = vld [vmem:[%s2730_s10 + $0x320] sm:$0xff]  ;;  %v386_v8 = vld [vmem:[%s2730_s10 + $0x328] sm:$0xff]  ;;  %v903_v9 = vmul.f32 %v3553_v38, %v3553_v38  ;;  %v884_v42 = vmul.f32 %v3503_v49, %v3503_v49  ;;  %v904_v47 = vmul.f32 %v3555_v58, %v3555_v58 }
  0xe1   : > { %4425 = vst [vmem:[#allocation93_spill] sm:$0xff] %v3566_v60  ;;  %4426 = vst [vmem:[#allocation94_spill] sm:$0xff] %v3568_v61  ;;  %v509_v33 = vld [vmem:[%s2738_s23 + $0x300] sm:$0xff]  ;;  %v510_v37 = vld [vmem:[%s2738_s23 + $0x308] sm:$0xff]  ;;  %v905_v59 = vmul.f32 %v3558_v40, %v3558_v40  ;;  %v3608_v7 = vmul.f32 %v3560_v1, %v3560_v1 }
  0xe2   : > { %773 = vst [vmem:[%s2781_s26 + $0x340] sm:$0xff] %v3549_v14  ;;  %774 = vst [vmem:[%s2781_s26 + $0x348] sm:$0xff] %v3551_v15  ;;  %v511_v63 = vld [vmem:[%s2738_s23 + $0x310] sm:$0xff]  ;;  %v512_v25 = vld [vmem:[%s2738_s23 + $0x318] sm:$0xff]  ;;  %v1018_v15 = vadd.f32 %v1017_v28, %v881_v10  ;;  %v1042_v14 = vadd.f32 %v902_v13, %v901_v3  ;;  %v3615_v19 = vadd.f32 %v509_v33, %v381_v27 }
  0xe3   : > { %775 = vst [vmem:[%s2781_s26 + $0x350] sm:$0xff] %v3553_v38  ;;  %776 = vst [vmem:[%s2781_s26 + $0x358] sm:$0xff] %v3555_v58  ;;  %v513_v53 = vld [vmem:[%s2738_s23 + $0x320] sm:$0xff]  ;;  %v387_v11 = vld [vmem:[%s2730_s10 + $0x330] sm:$0xff]  ;;  %v1030_v38 = vadd.f32 %v1029_v41, %v892_v0  ;;  %v3619_v39 = vadd.f32 %v511_v63, %v383_v4  ;;  %v3661_v63 = vmul.f32 %v3568_v61, %v3568_v61 }
  0xe4   : > { %777 = vst [vmem:[%s2781_s26 + $0x360] sm:$0xff] %v3558_v40  ;;  %778 = vst [vmem:[%s2781_s26 + $0x368] sm:$0xff] %v3560_v1  ;;  %v514_v56 = vld [vmem:[%s2738_s23 + $0x328] sm:$0xff]  ;;  %v515_v29 = vld [vmem:[%s2738_s23 + $0x330] sm:$0xff]  ;;  %v3617_v40 = vadd.f32 %v510_v37, %v382_v57  ;;  %v3621_v1 = vadd.f32 %v512_v25, %v384_v43  ;;  %v3623_v0 = vadd.f32 %v513_v53, %v385_v62 }
  0xe5   : > { %779 = vst [vmem:[%s2781_s26 + $0x370] sm:$0xff] %v3566_v60  ;;  %780 = vst [vmem:[%s2781_s26 + $0x378] sm:$0xff] %v3568_v61  ;;  %v388_v49 = vld [vmem:[%s2730_s10 + $0x338] sm:$0xff]  ;;  %v405_v10 = vld [vmem:[%s2730_s10 + $0x3c0] sm:$0xff]  ;;  %1031 = vadd.xlane.f32.xlu1 %v1030_v38  ;;  %v1019_v13 = vadd.f32 %v1018_v15, %v882_v2  ;;  %v1043_v41 = vadd.f32 %v1042_v14, %v903_v9  ;;  %v3627_v27 = vadd.f32 %v514_v56, %v386_v8 }
  0xe6   : > { %v516_v58 = vld [vmem:[%s2738_s23 + $0x338] sm:$0xff]  ;;  %4427 = vst [vmem:[#allocation95_spill] sm:$0xff] %v3615_v19  ;;  %4428 = vst [vmem:[#allocation96_spill] sm:$0xff] %v3617_v40  ;;  %v406_v3 = vld [vmem:[%s2730_s10 + $0x3c8] sm:$0xff]  ;;  %v3629_v57 = vadd.f32 %v515_v29, %v387_v11  ;;  %v893_v38 = vmul.f32 %v3615_v19, %v3615_v19  ;;  %v894_v14 = vmul.f32 %v3617_v40, %v3617_v40 }
  0xe7   : > { %4429 = vst [vmem:[#allocation97_spill] sm:$0xff] %v3619_v39  ;;  %4430 = vst [vmem:[#allocation98_spill] sm:$0xff] %v3621_v1  ;;  %v407_v4 = vld [vmem:[%s2730_s10 + $0x3d0] sm:$0xff]  ;;  %v408_v43 = vld [vmem:[%s2730_s10 + $0x3d8] sm:$0xff]  ;;  %v3636_v33 = vadd.f32 %v516_v58, %v388_v49  ;;  %v895_v15 = vmul.f32 %v3619_v39, %v3619_v39  ;;  %v1020_v28 = vadd.f32 %v1019_v13, %v883_v48 }
  0xe8   : > { %4431 = vst [vmem:[#allocation99_spill] sm:$0xff] %v3623_v0  ;;  %4432 = vst [vmem:[#allocation100_spill] sm:$0xff] %v3627_v27  ;;  %v409_v62 = vld [vmem:[%s2730_s10 + $0x3e0] sm:$0xff]  ;;  %v410_v49 = vld [vmem:[%s2730_s10 + $0x3e8] sm:$0xff]  ;;  %v907_v9 = vmul.f32 %v3566_v60, %v3566_v60  ;;  %v1044_v25 = vadd.f32 %v1043_v41, %v904_v47  ;;  %v896_v48 = vmul.f32 %v3621_v1, %v3621_v1 }
  0xe9   : > { %765 = vst [vmem:[%s2781_s26 + $0x300] sm:$0xff] %v3615_v19  ;;  %4433 = vst [vmem:[#allocation101_spill] sm:$0xff] %v3636_v33  ;;  %v411_v2 = vld [vmem:[%s2730_s10 + $0x3f0] sm:$0xff]  ;;  %v412_v58 = vld [vmem:[%s2730_s10 + $0x3f8] sm:$0xff]  ;;  %v897_v29 = vmul.f32 %v3623_v0, %v3623_v0  ;;  %v898_v47 = vmul.f32 %v3627_v27, %v3627_v27  ;;  %v1033_v13 = vadd.f32 %v894_v14, %v893_v38 }
  0xea   : > { %766 = vst [vmem:[%s2781_s26 + $0x308] sm:$0xff] %v3617_v40  ;;  %767 = vst [vmem:[%s2781_s26 + $0x310] sm:$0xff] %v3619_v39  ;;  %v533_v8 = vld [vmem:[%s2738_s23 + $0x3c0] sm:$0xff]  ;;  %v534_v37 = vld [vmem:[%s2738_s23 + $0x3c8] sm:$0xff]  ;;  %v1021_v19 = vadd.f32 %v1020_v28, %v884_v42  ;;  %v1045_v61 = vadd.f32 %v1044_v25, %v905_v59  ;;  %v900_v28 = vmul.f32 %v3636_v33, %v3636_v33 }
  0xeb   : > { %768 = vst [vmem:[%s2781_s26 + $0x318] sm:$0xff] %v3621_v1  ;;  %769 = vst [vmem:[%s2781_s26 + $0x320] sm:$0xff] %v3623_v0  ;;  %v535_v53 = vld [vmem:[%s2738_s23 + $0x3d0] sm:$0xff]  ;;  %v536_v11 = vld [vmem:[%s2738_s23 + $0x3d8] sm:$0xff]  ;;  %v3681_v60 = vadd.f32 %v533_v8, %v405_v10  ;;  %v3683_v1 = vadd.f32 %v534_v37, %v406_v3  ;;  %v1034_v5 = vadd.f32 %v1033_v13, %v895_v15 }
  0xec   : > { %770 = vst [vmem:[%s2781_s26 + $0x328] sm:$0xff] %v3627_v27  ;;  %771 = vst [vmem:[%s2781_s26 + $0x330] sm:$0xff] %v3629_v57  ;;  %v537_v56 = vld [vmem:[%s2738_s23 + $0x3e0] sm:$0xff]  ;;  %v538_v41 = vld [vmem:[%s2738_s23 + $0x3e8] sm:$0xff]  ;;  %v3685_v0 = vadd.f32 %v535_v53, %v407_v4  ;;  %v3687_v27 = vadd.f32 %v536_v11, %v408_v43  ;;  %1022 = vadd.xlane.f32.xlu0 %v1021_v19  ;;  %v1046_v59 = vadd.f32 %v1045_v61, %v3608_v7 }
  0xed   : > { %772 = vst [vmem:[%s2781_s26 + $0x338] sm:$0xff] %v3636_v33  ;;  %v539_v39 = vld [vmem:[%s2738_s23 + $0x3f0] sm:$0xff]  ;;  %v540_v40 = vld [vmem:[%s2738_s23 + $0x3f8] sm:$0xff]  ;;  %4434 = vst [vmem:[#allocation102_spill] sm:$0xff] %v3681_v60  ;;  %v3689_v38 = vadd.f32 %v537_v56, %v409_v62  ;;  %v3694_v10 = vadd.f32 %v538_v41, %v410_v49  ;;  %v1035_v61 = vadd.f32 %v1034_v5, %v896_v48 }
  0xee   : > { %4435 = vst [vmem:[#allocation103_spill] sm:$0xff] %v3683_v1  ;;  %4436 = vst [vmem:[#allocation104_spill] sm:$0xff] %v3685_v0  ;;  %v397_v42 = vld [vmem:[%s2730_s10 + $0x380] sm:$0xff]  ;;  %v398_v14 = vld [vmem:[%s2730_s10 + $0x388] sm:$0xff]  ;;  %v3696_v3 = vadd.f32 %v539_v39, %v411_v2  ;;  %v3698_v4 = vadd.f32 %v540_v40, %v412_v58  ;;  %v917_v39 = vmul.f32 %v3681_v60, %v3681_v60 }
  0xef   : > { %4437 = vst [vmem:[#allocation105_spill] sm:$0xff] %v3687_v27  ;;  %4438 = vst [vmem:[#allocation106_spill] sm:$0xff] %v3689_v38  ;;  %v399_v43 = vld [vmem:[%s2730_s10 + $0x390] sm:$0xff]  ;;  %v400_v62 = vld [vmem:[%s2730_s10 + $0x398] sm:$0xff]  ;;  %v918_v40 = vmul.f32 %v3683_v1, %v3683_v1  ;;  %v919_v5 = vmul.f32 %v3685_v0, %v3685_v0  ;;  %v1047_v8 = vadd.f32 %v1046_v59, %v907_v9 }
  0xf0   : > { %4439 = vst [vmem:[#allocation107_spill] sm:$0xff] %v3694_v10  ;;  %789 = vst [vmem:[%s2781_s26 + $0x3c0] sm:$0xff] %v3681_v60  ;;  %v401_v19 = vld [vmem:[%s2730_s10 + $0x3a0] sm:$0xff]  ;;  %v402_v7 = vld [vmem:[%s2730_s10 + $0x3a8] sm:$0xff]  ;;  %v899_v37 = vmul.f32 %v3629_v57, %v3629_v57  ;;  %v920_v25 = vmul.f32 %v3687_v27, %v3687_v27  ;;  %v1036_v9 = vadd.f32 %v1035_v61, %v897_v29 }
  0xf1   : > { %790 = vst [vmem:[%s2781_s26 + $0x3c8] sm:$0xff] %v3683_v1  ;;  %791 = vst [vmem:[%s2781_s26 + $0x3d0] sm:$0xff] %v3685_v0  ;;  %v403_v15 = vld [vmem:[%s2730_s10 + $0x3b0] sm:$0xff]  ;;  %v525_v49 = vld [vmem:[%s2738_s23 + $0x380] sm:$0xff]  ;;  %v921_v48 = vmul.f32 %v3689_v38, %v3689_v38  ;;  %v922_v13 = vmul.f32 %v3694_v10, %v3694_v10  ;;  %v1060_v41 = vadd.f32 %v918_v40, %v917_v39 }
  0xf2   : > { %792 = vst [vmem:[%s2781_s26 + $0x3d8] sm:$0xff] %v3687_v27  ;;  %793 = vst [vmem:[%s2781_s26 + $0x3e0] sm:$0xff] %v3689_v38  ;;  %v526_v2 = vld [vmem:[%s2738_s23 + $0x388] sm:$0xff]  ;;  %v527_v58 = vld [vmem:[%s2738_s23 + $0x390] sm:$0xff]  ;;  %v1048_v60 = vadd.f32 %v1047_v8, %v3661_v63  ;;  %v3747_v27 = vadd.f32 %v525_v49, %v397_v42  ;;  %v1037_v61 = vadd.f32 %v1036_v9, %v898_v47 }
  0xf3   : > { %794 = vst [vmem:[%s2781_s26 + $0x3e8] sm:$0xff] %v3694_v10  ;;  %795 = vst [vmem:[%s2781_s26 + $0x3f0] sm:$0xff] %v3696_v3  ;;  %v404_v53 = vld [vmem:[%s2730_s10 + $0x3b8] sm:$0xff]  ;;  %v529_v56 = vld [vmem:[%s2738_s23 + $0x3a0] sm:$0xff]  ;;  %v3749_v33 = vadd.f32 %v526_v2, %v398_v14  ;;  %v3751_v29 = vadd.f32 %v527_v58, %v399_v43  ;;  %v1061_v38 = vadd.f32 %v1060_v41, %v919_v5  ;;  %v1248_v41 = vlaneseq }
  0xf4   : > { %796 = vst [vmem:[%s2781_s26 + $0x3f8] sm:$0xff] %v3698_v4  ;;  %v528_v11 = vld [vmem:[%s2738_s23 + $0x398] sm:$0xff]  ;;  %v530_v59 = vld [vmem:[%s2738_s23 + $0x3a8] sm:$0xff]  ;;  %v531_v0 = vld [vmem:[%s2738_s23 + $0x3b0] sm:$0xff]  ;;  %v3755_v39 = vadd.f32 %v529_v56, %v401_v19  ;;  %1049 = vadd.xlane.f32.xlu1 %v1048_v60  ;;  %v909_v47 = vmul.f32 %v3747_v27, %v3747_v27  ;;  %v1038_v14 = vadd.f32 %v1037_v61, %v899_v37 }
  0xf5   : > { %v532_v1 = vld [vmem:[%s2738_s23 + $0x3b8] sm:$0xff]  ;;  %v3753_v10 = vadd.f32 %v528_v11, %v400_v62  ;;  %v3757_v40 = vadd.f32 %v530_v59, %v402_v7  ;;  %v3759_v63 = vadd.f32 %v531_v0, %v403_v15  ;;  %781 = vst [vmem:[%s2781_s26 + $0x380] sm:$0xff] %v3747_v27  ;;  %782 = vst [vmem:[%s2781_s26 + $0x388] sm:$0xff] %v3749_v33 }
  0xf6   : > { %v3761_v42 = vadd.f32 %v532_v1, %v404_v53  ;;  %783 = vst [vmem:[%s2781_s26 + $0x390] sm:$0xff] %v3751_v29  ;;  %v1062_v43 = vadd.f32 %v1061_v38, %v920_v25  ;;  %785 = vst [vmem:[%s2781_s26 + $0x3a0] sm:$0xff] %v3755_v39  ;;  %v910_v60 = vmul.f32 %v3749_v33, %v3749_v33 }
  0xf7   : > { %784 = vst [vmem:[%s2781_s26 + $0x398] sm:$0xff] %v3753_v10  ;;  %v911_v1 = vmul.f32 %v3751_v29, %v3751_v29  ;;  %v923_v0 = vmul.f32 %v3696_v3, %v3696_v3  ;;  %786 = vst [vmem:[%s2781_s26 + $0x3a8] sm:$0xff] %v3757_v40  ;;  %v1039_v38 = vadd.f32 %v1038_v14, %v900_v28 }
  0xf8   : > { %787 = vst [vmem:[%s2781_s26 + $0x3b0] sm:$0xff] %v3759_v63  ;;  %788 = vst [vmem:[%s2781_s26 + $0x3b8] sm:$0xff] %v3761_v42  ;;  %v1063_v62 = vadd.f32 %v1062_v43, %v921_v48  ;;  %v912_v19 = vmul.f32 %v3753_v10, %v3753_v10  ;;  %v1051_v5 = vadd.f32 %v910_v60, %v909_v47  ;;  %v1249_v47 = vshrl.u32 %v1248_v41, 7 }
  0xf9   : > { %1040 = vadd.xlane.f32.xlu0 %v1039_v38  ;;  %v924_v7 = vmul.f32 %v3698_v4, %v3698_v4  ;;  %v913_v49 = vmul.f32 %v3755_v39, %v3755_v39  ;;  %v914_v8 = vmul.f32 %v3757_v40, %v3757_v40  ;;  %v915_v25 = vmul.f32 %v3759_v63, %v3759_v63  ;;  %v1246_v38 = vld [vmem:[#allocation7] sm:$0xff] }
  0xfa   : > { %v1064_v15 = vadd.f32 %v1063_v62, %v922_v13  ;;  %v1052_v2 = vadd.f32 %v1051_v5, %v911_v1  ;;  %v916_v11 = vmul.f32 %v3761_v42, %v3761_v42  ;;  %v1250_v1 = vsub.s32 0, %v1249_v47 }
  0xfb   : > { %v1258_v62 = vsub.s32 2, %v1249_v47  ;;  %v1266_v5 = vsub.s32 4, %v1249_v47 }
  0xfc   : > { %v1065_v58 = vadd.f32 %v1064_v15, %v923_v0  ;;  %v1053_v37 = vadd.f32 %v1052_v2, %v912_v19  ;;  %v1254_v0 = vsub.s32 1, %v1249_v47  ;;  %v1262_v19 = vsub.s32 3, %v1249_v47 }
  0xfe   : > { %v1066_v28 = vadd.f32 %v1065_v58, %v924_v7  ;;  %v1054_v53 = vadd.f32 %v1053_v37, %v913_v49 }
 0x100   : > { %1067 = vadd.xlane.f32.xlu1 %v1066_v28  ;;  %v1055_v56 = vadd.f32 %v1054_v53, %v914_v8 }
 0x102   : > { %v1056_v9 = vadd.f32 %v1055_v56, %v915_v25 }
 0x104   : > { %v1057_v48 = vadd.f32 %v1056_v9, %v916_v11 }
 0x106   : > { %1058 = vadd.xlane.f32.xlu0 %v1057_v48 }
 0x123   : > { %v951_v13 = vpop.xlane.xlu1 %950 }
 0x124   : > { %v1072_v59 = vmul.f32 0.0009765625, %v951_v13 }
 0x126   : > { %v1088_v61 = vadd.f32 1e-06, %v1072_v59 }
 0x128   : > { %2275 = vrsqrt.f32 %v1088_v61 }
 0x129   : > { %v933_v14 = vpop.xlane.xlu0 %932 }
 0x12a   : > { %v1070_v43 = vmul.f32 0.0009765625, %v933_v14 }
 0x12c   : > { %v1086_v60 = vadd.f32 1e-06, %v1070_v43 }
 0x12e   : > { %2277 = vrsqrt.f32 %v1086_v60 }
 0x12f   : > { %2408 = shalt.err (!%p2405_p8)
}
 0x130   : > { %s2409_s12 = scalar_lea.hbm %s3804_s6, 16384  ;;  %s2413_s29 = scalar_lea.hbm %s4235_s4, 32768 }
 0x131   : > { %p2410_p10 = scmp.ne.s32.totalorder %s3804_s6, %s2409_s12  ;;  %p2414_p9 = scmp.lt.u32.totalorder %s3804_s6, %s4235_s4 }
 0x132   : > { %p2415_p11 = scmp.lt.u32.totalorder %s2413_s29, %s2409_s12  ;;  %p2417_p5 = scmp.lt.u32.totalorder %s2409_s12, %s3804_s6 }
 0x133   : > { %p2411_p2 = pnand %p2410_p10, %p4440_p0 }
 0x134   : > { %p2416_p4 = por %p2415_p11, %p2414_p9 }
 0x135   : > { %p2412_p12 = pneg %p2411_p2 }
 0x136   : > { %p2418_p6 = por %p2417_p5, %p2416_p4 }
 0x138   : > { %p2419_p13 = pnand %p2418_p6, %p2412_p12 }
 0x13a   : > { %2422 = shalt.err (!%p2419_p13)
}
 0x13b   : > { %s2509_s26 = smov 1024   ;;  %s2510_s11 = smov 64   ;;  %v1270_v7 = vsub.s32 5, %v1249_v47  ;;  %v1274_v15 = vsub.s32 6, %v1249_v47  ;;  %v1278_v49 = vsub.s32 7, %v1249_v47  ;;  %v960_v2 = vpop.xlane.xlu1 %959  ;;  %v3832_v8 = vrot.slane %v1246_v38, %v1250_v1  ;;  %v2276_v11 = vpop.eup %2275 }
 0x13c   : > { %2211 = dma.vmem_to_hbm [thread:$0]  (%p4440_p0), %s3806_s13, 16384, %s3804_s6, %s1870_s25, %s2509_s26, %s2509_s26, %s2510_s11   ;;  %v1073_v58 = vmul.f32 0.0009765625, %v960_v2  ;;  %v3834_v37 = vrot.slane %v1246_v38, %v1254_v0  ;;  %v3836_v28 = vrot.slane %v1246_v38, %v1258_v62  ;;  %v3838_v25 = vrot.slane %v1246_v38, %v1262_v19  ;;  %v942_v0 = vpop.xlane.xlu0 %941 }
 0x13d   : > { %v3840_v53 = vrot.slane %v1246_v38, %v1266_v5  ;;  %v3842_v56 = vrot.slane %v1246_v38, %v1270_v7  ;;  %v3844_v9 = vrot.slane %v1246_v38, %v1274_v15  ;;  %v3846_v48 = vrot.slane %v1246_v38, %v1278_v49  ;;  %s2054_s13 = sshll.u32 %s2723_s0, 9  ;;  %s2199_s20 = sshll.u32 %s2560_s19, 13 }
 0x13e   : > { %v1089_v13 = vadd.f32 1e-06, %v1073_v58  ;;  %v1134_v41 = vmul.f32 %v2276_v11, %v2760_v12  ;;  %v1135_v59 = vmul.f32 %v2276_v11, %v2765_v16  ;;  %v1136_v61 = vmul.f32 %v2276_v11, %v2767_v17  ;;  %s3867_s5 = scalar_lea.vmem [#allocation8], %s2054_s13  ;;  %s4181_s9 = scalar_lea.hbm %s4234_s3, %s2199_s20 }
 0x13f   : > { %v1137_v47 = vmul.f32 %v2276_v11, %v2769_v18  ;;  %v1138_v14 = vmul.f32 %v2276_v11, %v2772_v20  ;;  %v1139_v43 = vmul.f32 %v2276_v11, %v2774_v21  ;;  %v1140_v60 = vmul.f32 %v2276_v11, %v2776_v22  ;;  %v2278_v22 = vpop.eup %2277  ;;  %s1884_s6 = sshll.u32 %s3867_s5, 4  ;;  %s1865_s30 = scalar_lea.sflag [#allocation4], %s2723_s0  ;;  %s4183_s6 = int_to_ptr.vmem [resolvable:$true] %s1884_s6 }
 0x140   : > { %v1141_v1 = vmul.f32 %v2276_v11, %v2787_v26  ;;  %v1304_v38 = vmul.f32 %v3832_v8, %v1134_v41  ;;  %v1305_v62 = vmul.f32 %v3834_v37, %v1135_v59  ;;  %v1306_v12 = vmul.f32 %v3836_v28, %v1136_v61  ;;  %s2423_s7 = scalar_lea.vmem %s4183_s6, 8192  ;;  %s2511_s14 = smov [#allocation8]  }
 0x141   : > { %v1307_v16 = vmul.f32 %v3838_v25, %v1137_v47  ;;  %v1308_v17 = vmul.f32 %v3840_v53, %v1138_v14  ;;  %v1309_v18 = vmul.f32 %v3842_v56, %v1139_v43  ;;  %v1310_v20 = vmul.f32 %v3844_v9, %v1140_v60  ;;  %p2424_p7 = scmp.ne.s32.totalorder %s4183_s6, %s2423_s7  ;;  %s2427_s12 = sshll.u32 %s2511_s14, 4  ;;  %s2428_s12 = int_to_ptr.vmem [resolvable:$false] %s2427_s12 }
 0x142   : > { %v1311_v21 = vmul.f32 %v3846_v48, %v1141_v1  ;;  %v2142_v19 = vpack.c.bf16 %v1305_v62, %v1304_v38  ;;  %2279 = vrsqrt.f32 %v1089_v13  ;;  %v1071_v5 = vmul.f32 0.0009765625, %v942_v0  ;;  %v978_v47 = vpop.xlane.xlu1 %977  ;;  %s2429_s8 = scalar_lea.vmem %s2428_s12, 16384  ;;  %p2430_p8 = scmp.lt.s32.totalorder %s4183_s6, %s2428_s12 }
 0x143   : > { %v2143_v26 = vpack.c.bf16 %v1307_v16, %v1306_v12  ;;  %v2144_v7 = vpack.c.bf16 %v1309_v18, %v1308_v17  ;;  %v1118_v49 = vmul.f32 %v2278_v22, %v2823_v44  ;;  %v1119_v2 = vmul.f32 %v2278_v22, %v2825_v45  ;;  %p2425_p3 = pnand %p2424_p7, %p4440_p0  ;;  %p2431_p10 = scmp.lt.s32.totalorder %s2429_s8, %s2423_s7 }
 0x144   : > { %v2145_v15 = vpack.c.bf16 %v1311_v21, %v1310_v20  ;;  %1808 = vst [vmem:[%s3867_s5 + $0x40] sm:$0xff] %v2142_v19  ;;  %v1120_v58 = vmul.f32 %v2278_v22, %v2827_v46  ;;  %v1121_v11 = vmul.f32 %v2278_v22, %v2831_v50  ;;  %v1122_v13 = vmul.f32 %v2278_v22, %v2833_v51 }
 0x145   : > { %1809 = vst [vmem:[%s3867_s5 + $0x48] sm:$0xff] %v2143_v26  ;;  %v1123_v41 = vmul.f32 %v2278_v22, %v2835_v52  ;;  %1810 = vst [vmem:[%s3867_s5 + $0x50] sm:$0xff] %v2144_v7  ;;  %v1124_v44 = vmul.f32 %v2278_v22, %v2838_v54  ;;  %v1125_v45 = vmul.f32 %v2278_v22, %v2840_v55  ;;  %v1087_v43 = vadd.f32 1e-06, %v1071_v5  ;;  %p2426_p1 = pneg %p2425_p3  ;;  %p2432_p2 = por %p2431_p10, %p2430_p8 }
 0x146   : > { %1811 = vst [vmem:[%s3867_s5 + $0x58] sm:$0xff] %v2145_v15  ;;  %v1288_v59 = vmul.f32 %v3832_v8, %v1118_v49  ;;  %v1289_v61 = vmul.f32 %v3834_v37, %v1119_v2  ;;  %v1290_v46 = vmul.f32 %v3836_v28, %v1120_v58  ;;  %v1291_v50 = vmul.f32 %v3838_v25, %v1121_v11 }
 0x147   : > { %v1292_v51 = vmul.f32 %v3840_v53, %v1122_v13  ;;  %v1293_v52 = vmul.f32 %v3842_v56, %v1123_v41  ;;  %v1294_v54 = vmul.f32 %v3844_v9, %v1124_v44  ;;  %v1295_v55 = vmul.f32 %v3846_v48, %v1125_v45  ;;  %p2433_p12 = pnand %p2432_p2, %p2426_p1 }
 0x148   : > { %v2134_v14 = vpack.c.bf16 %v1289_v61, %v1288_v59  ;;  %v2135_v60 = vpack.c.bf16 %v1291_v50, %v1290_v46  ;;  %v1075_v0 = vmul.f32 0.0009765625, %v978_v47  ;;  %2281 = vrsqrt.f32 %v1087_v43  ;;  %v969_v12 = vpop.xlane.xlu0 %968  ;;  %v4441_v61 = vld [vmem:[#allocation16_spill] sm:$0xff]  ;;  %v4442_v46 = vld [vmem:[#allocation17_spill] sm:$0xff] }
 0x149   : > { %v2136_v1 = vpack.c.bf16 %v1293_v52, %v1292_v51  ;;  %v2137_v38 = vpack.c.bf16 %v1295_v55, %v1294_v54  ;;  %v1074_v17 = vmul.f32 0.0009765625, %v969_v12  ;;  %v4443_v51 = vld [vmem:[#allocation18_spill] sm:$0xff]  ;;  %v4444_v54 = vld [vmem:[#allocation19_spill] sm:$0xff] }
 0x14a   : > { %1800 = vst [vmem:[%s3867_s5] sm:$0xff] %v2134_v14  ;;  %1801 = vst [vmem:[%s3867_s5 + $0x8] sm:$0xff] %v2135_v60  ;;  %v1091_v62 = vadd.f32 1e-06, %v1075_v0  ;;  %v4445_v14 = vld [vmem:[#allocation20_spill] sm:$0xff]  ;;  %v4446_v60 = vld [vmem:[#allocation21_spill] sm:$0xff] }
 0x14b   : > { %1802 = vst [vmem:[%s3867_s5 + $0x10] sm:$0xff] %v2136_v1  ;;  %1803 = vst [vmem:[%s3867_s5 + $0x18] sm:$0xff] %v2137_v38  ;;  %v1090_v58 = vadd.f32 1e-06, %v1074_v17  ;;  %v4447_v0 = vld [vmem:[#allocation22_spill] sm:$0xff] }
 0x14c   : > { %v2280_v16 = vpop.eup %2279  ;;  %2283 = vrsqrt.f32 %v1091_v62 }
 0x14d   : > { %v1142_v18 = vmul.f32 %v2280_v16, %v2888_v23  ;;  %v1143_v20 = vmul.f32 %v2280_v16, %v2890_v24  ;;  %v1144_v21 = vmul.f32 %v2280_v16, %v2895_v30  ;;  %v1145_v22 = vmul.f32 %v2280_v16, %v2897_v31 }
 0x14e   : > { %v1146_v19 = vmul.f32 %v2280_v16, %v2899_v32  ;;  %v1147_v26 = vmul.f32 %v2280_v16, %v2901_v34  ;;  %v1148_v5 = vmul.f32 %v2280_v16, %v2903_v35  ;;  %v1149_v7 = vmul.f32 %v2280_v16, %v2905_v36 }
 0x14f   : > { %v1312_v15 = vmul.f32 %v3832_v8, %v1142_v18  ;;  %v1313_v49 = vmul.f32 %v3834_v37, %v1143_v20  ;;  %v1314_v23 = vmul.f32 %v3836_v28, %v1144_v21  ;;  %v1315_v24 = vmul.f32 %v3838_v25, %v1145_v22 }
 0x150   : > { %v1316_v30 = vmul.f32 %v3840_v53, %v1146_v19  ;;  %v1317_v31 = vmul.f32 %v3842_v56, %v1147_v26  ;;  %v1318_v32 = vmul.f32 %v3844_v9, %v1148_v5  ;;  %v1319_v34 = vmul.f32 %v3846_v48, %v1149_v7  ;;  %v4448_v5 = vld [vmem:[#allocation23_spill] sm:$0xff] }
 0x151   : > { %v2146_v36 = vpack.c.bf16 %v1313_v49, %v1312_v15  ;;  %v2147_v2 = vpack.c.bf16 %v1315_v24, %v1314_v23  ;;  %2285 = vrsqrt.f32 %v1090_v58  ;;  %v4449_v15 = vld [vmem:[#allocation24_spill] sm:$0xff] }
 0x152   : > { %v996_v35 = vpop.xlane.xlu1 %995  ;;  %v2148_v13 = vpack.c.bf16 %v1317_v31, %v1316_v30  ;;  %v2149_v41 = vpack.c.bf16 %v1319_v34, %v1318_v32  ;;  %v2282_v44 = vpop.eup %2281  ;;  %v4450_v30 = vld [vmem:[#allocation25_spill] sm:$0xff]  ;;  %v4451_v32 = vld [vmem:[#allocation26_spill] sm:$0xff] }
 0x153   : > { %v1077_v11 = vmul.f32 0.0009765625, %v996_v35  ;;  %1812 = vst [vmem:[%s3867_s5 + $0x60] sm:$0xff] %v2146_v36  ;;  %1813 = vst [vmem:[%s3867_s5 + $0x68] sm:$0xff] %v2147_v2  ;;  %v1126_v59 = vmul.f32 %v2282_v44, %v2956_v6  ;;  %v1127_v47 = vmul.f32 %v2282_v44, %v4441_v61  ;;  %v1128_v50 = vmul.f32 %v2282_v44, %v4442_v46  ;;  %v4452_v35 = vld [vmem:[#allocation27_spill] sm:$0xff]  ;;  %v4453_v2 = vld [vmem:[#allocation28_spill] sm:$0xff] }
 0x154   : > { %1814 = vst [vmem:[%s3867_s5 + $0x70] sm:$0xff] %v2148_v13  ;;  %1815 = vst [vmem:[%s3867_s5 + $0x78] sm:$0xff] %v2149_v41  ;;  %v1129_v52 = vmul.f32 %v2282_v44, %v4443_v51  ;;  %v1130_v55 = vmul.f32 %v2282_v44, %v4444_v54  ;;  %v1131_v43 = vmul.f32 %v2282_v44, %v4445_v14  ;;  %v4455_v41 = vld [vmem:[#allocation30_spill] sm:$0xff] }
 0x155   : > { %v1093_v45 = vadd.f32 1e-06, %v1077_v11  ;;  %v1132_v1 = vmul.f32 %v2282_v44, %v4446_v60  ;;  %v1133_v38 = vmul.f32 %v2282_v44, %v4447_v0  ;;  %v1296_v12 = vmul.f32 %v3832_v8, %v1126_v59  ;;  %v4454_v11 = vld [vmem:[#allocation29_spill] sm:$0xff] }
 0x156   : > { %v2284_v62 = vpop.eup %2283  ;;  %v1297_v6 = vmul.f32 %v3834_v37, %v1127_v47  ;;  %v1298_v16 = vmul.f32 %v3836_v28, %v1128_v50  ;;  %v1299_v17 = vmul.f32 %v3838_v25, %v1129_v52  ;;  %v1300_v18 = vmul.f32 %v3840_v53, %v1130_v55 }
 0x157   : > { %v1301_v20 = vmul.f32 %v3842_v56, %v1131_v43  ;;  %v1302_v21 = vmul.f32 %v3844_v9, %v1132_v1  ;;  %v1303_v22 = vmul.f32 %v3846_v48, %v1133_v38  ;;  %v1158_v7 = vmul.f32 %v2284_v62, %v4448_v5 }
 0x158   : > { %v2138_v19 = vpack.c.bf16 %v1297_v6, %v1296_v12  ;;  %v2139_v26 = vpack.c.bf16 %v1299_v17, %v1298_v16  ;;  %v1159_v49 = vmul.f32 %v2284_v62, %v4449_v15  ;;  %v1160_v31 = vmul.f32 %v2284_v62, %v4450_v30  ;;  %v4457_v6 = vld [vmem:[#allocation32_spill] sm:$0xff]  ;;  %v4458_v17 = vld [vmem:[#allocation33_spill] sm:$0xff]  ;;  %v4463_v15 = vld [vmem:[#allocation38_spill] sm:$0xff] }
 0x159   : > { %v2140_v23 = vpack.c.bf16 %v1301_v20, %v1300_v18  ;;  %v2141_v24 = vpack.c.bf16 %v1303_v22, %v1302_v21  ;;  %v1161_v34 = vmul.f32 %v2284_v62, %v4451_v32  ;;  %v1162_v36 = vmul.f32 %v2284_v62, %v4452_v35  ;;  %v987_v59 = vpop.xlane.xlu0 %986  ;;  %v4459_v20 = vld [vmem:[#allocation34_spill] sm:$0xff]  ;;  %v4460_v22 = vld [vmem:[#allocation35_spill] sm:$0xff] }
 0x15a   : > { %1804 = vst [vmem:[%s3867_s5 + $0x20] sm:$0xff] %v2138_v19  ;;  %1805 = vst [vmem:[%s3867_s5 + $0x28] sm:$0xff] %v2139_v26  ;;  %v1163_v58 = vmul.f32 %v2284_v62, %v4453_v2  ;;  %v1164_v13 = vmul.f32 %v2284_v62, %v4454_v11  ;;  %v1165_v44 = vmul.f32 %v2284_v62, %v4455_v41  ;;  %2287 = vrsqrt.f32 %v1093_v45  ;;  %v4456_v62 = vld [vmem:[#allocation31_spill] sm:$0xff]  ;;  %v4461_v26 = vld [vmem:[#allocation36_spill] sm:$0xff] }
 0x15b   : > { %1806 = vst [vmem:[%s3867_s5 + $0x30] sm:$0xff] %v2140_v23  ;;  %1807 = vst [vmem:[%s3867_s5 + $0x38] sm:$0xff] %v2141_v24  ;;  %v1328_v61 = vmul.f32 %v3832_v8, %v1158_v7  ;;  %v1329_v47 = vmul.f32 %v3834_v37, %v1159_v49  ;;  %v1330_v46 = vmul.f32 %v3836_v28, %v1160_v31  ;;  %v2286_v14 = vpop.eup %2285  ;;  %v1076_v1 = vmul.f32 0.0009765625, %v987_v59  ;;  %v4462_v45 = vld [vmem:[#allocation37_spill] sm:$0xff] }
 0x15c   : > { %v1331_v50 = vmul.f32 %v3838_v25, %v1161_v34  ;;  %v1332_v51 = vmul.f32 %v3840_v53, %v1162_v36  ;;  %v1333_v52 = vmul.f32 %v3842_v56, %v1163_v58  ;;  %v1334_v54 = vmul.f32 %v3844_v9, %v1164_v13 }
 0x15d   : > { %v1335_v55 = vmul.f32 %v3846_v48, %v1165_v44  ;;  %v2154_v43 = vpack.c.bf16 %v1329_v47, %v1328_v61  ;;  %v1150_v12 = vmul.f32 %v2286_v14, %v4456_v62  ;;  %v1151_v16 = vmul.f32 %v2286_v14, %v4457_v6 }
 0x15e   : > { %v2155_v60 = vpack.c.bf16 %v1331_v50, %v1330_v46  ;;  %v2156_v0 = vpack.c.bf16 %v1333_v52, %v1332_v51  ;;  %v1152_v18 = vmul.f32 %v2286_v14, %v4458_v17  ;;  %v1153_v21 = vmul.f32 %v2286_v14, %v4459_v20  ;;  %v4464_v52 = vld [vmem:[#allocation39_spill] sm:$0xff] }
 0x15f   : > { %v2157_v38 = vpack.c.bf16 %v1335_v55, %v1334_v54  ;;  %1820 = vst [vmem:[%s3867_s5 + $0xa0] sm:$0xff] %v2154_v43  ;;  %v1154_v19 = vmul.f32 %v2286_v14, %v4460_v22  ;;  %v1155_v5 = vmul.f32 %v2286_v14, %v4461_v26  ;;  %v1156_v7 = vmul.f32 %v2286_v14, %v4462_v45  ;;  %v4465_v55 = vld [vmem:[#allocation40_spill] sm:$0xff]  ;;  %v4466_v43 = vld [vmem:[#allocation41_spill] sm:$0xff] }
 0x160   : > { %1821 = vst [vmem:[%s3867_s5 + $0xa8] sm:$0xff] %v2155_v60  ;;  %1822 = vst [vmem:[%s3867_s5 + $0xb0] sm:$0xff] %v2156_v0  ;;  %v1157_v49 = vmul.f32 %v2286_v14, %v4463_v15  ;;  %v1320_v23 = vmul.f32 %v3832_v8, %v1150_v12  ;;  %v1321_v24 = vmul.f32 %v3834_v37, %v1151_v16  ;;  %v1092_v13 = vadd.f32 1e-06, %v1076_v1  ;;  %v4467_v1 = vld [vmem:[#allocation42_spill] sm:$0xff]  ;;  %v4469_v12 = vld [vmem:[#allocation44_spill] sm:$0xff] }
 0x161   : > { %1823 = vst [vmem:[%s3867_s5 + $0xb8] sm:$0xff] %v2157_v38  ;;  %v1322_v31 = vmul.f32 %v3836_v28, %v1152_v18  ;;  %v1323_v32 = vmul.f32 %v3838_v25, %v1153_v21  ;;  %v1324_v34 = vmul.f32 %v3840_v53, %v1154_v19  ;;  %v1325_v35 = vmul.f32 %v3842_v56, %v1155_v5  ;;  %v4468_v38 = vld [vmem:[#allocation43_spill] sm:$0xff]  ;;  %v4470_v16 = vld [vmem:[#allocation45_spill] sm:$0xff]  ;;  %v4471_v18 = vld [vmem:[#allocation46_spill] sm:$0xff] }
 0x162   : > { %v1014_v30 = vpop.xlane.xlu1 %1013  ;;  %v1326_v2 = vmul.f32 %v3844_v9, %v1156_v7  ;;  %v1327_v58 = vmul.f32 %v3846_v48, %v1157_v49  ;;  %v2150_v11 = vpack.c.bf16 %v1321_v24, %v1320_v23  ;;  %2289 = vrsqrt.f32 %v1092_v13  ;;  %v4473_v13 = vld [vmem:[#allocation48_spill] sm:$0xff] }
 0x163   : > { %v2151_v41 = vpack.c.bf16 %v1323_v32, %v1322_v31  ;;  %v2152_v44 = vpack.c.bf16 %v1325_v35, %v1324_v34  ;;  %v1079_v59 = vmul.f32 0.0009765625, %v1014_v30 }
 0x164   : > { %v2153_v47 = vpack.c.bf16 %v1327_v58, %v1326_v2  ;;  %1816 = vst [vmem:[%s3867_s5 + $0x80] sm:$0xff] %v2150_v11  ;;  %v2288_v50 = vpop.eup %2287  ;;  %v4472_v58 = vld [vmem:[#allocation47_spill] sm:$0xff] }
 0x165   : > { %1817 = vst [vmem:[%s3867_s5 + $0x88] sm:$0xff] %v2151_v41  ;;  %1818 = vst [vmem:[%s3867_s5 + $0x90] sm:$0xff] %v2152_v44  ;;  %v1095_v46 = vadd.f32 1e-06, %v1079_v59  ;;  %v1174_v54 = vmul.f32 %v2288_v50, %v4464_v52  ;;  %v1175_v14 = vmul.f32 %v2288_v50, %v4465_v55  ;;  %v1176_v60 = vmul.f32 %v2288_v50, %v4466_v43  ;;  %v4474_v44 = vld [vmem:[#allocation49_spill] sm:$0xff] }
 0x166   : > { %1819 = vst [vmem:[%s3867_s5 + $0x98] sm:$0xff] %v2153_v47  ;;  %v1177_v0 = vmul.f32 %v2288_v50, %v4467_v1  ;;  %v1178_v62 = vmul.f32 %v2288_v50, %v4468_v38  ;;  %v1179_v6 = vmul.f32 %v2288_v50, %v4469_v12  ;;  %v1180_v17 = vmul.f32 %v2288_v50, %v4470_v16 }
 0x167   : > { %2291 = vrsqrt.f32 %v1095_v46  ;;  %v1181_v20 = vmul.f32 %v2288_v50, %v4471_v18  ;;  %v1344_v22 = vmul.f32 %v3832_v8, %v1174_v54  ;;  %v1345_v19 = vmul.f32 %v3834_v37, %v1175_v14  ;;  %v4476_v46 = vld [vmem:[#allocation51_spill] sm:$0xff]  ;;  %v4478_v54 = vld [vmem:[#allocation53_spill] sm:$0xff]  ;;  %v4479_v14 = vld [vmem:[#allocation54_spill] sm:$0xff] }
 0x168   : > { %v1005_v36 = vpop.xlane.xlu0 %1004  ;;  %v1346_v26 = vmul.f32 %v3836_v28, %v1176_v60  ;;  %v1347_v5 = vmul.f32 %v3838_v25, %v1177_v0  ;;  %v1348_v45 = vmul.f32 %v3840_v53, %v1178_v62  ;;  %v1349_v7 = vmul.f32 %v3842_v56, %v1179_v6 }
 0x169   : > { %v1078_v61 = vmul.f32 0.0009765625, %v1005_v36  ;;  %v1350_v15 = vmul.f32 %v3844_v9, %v1180_v17  ;;  %v1351_v49 = vmul.f32 %v3846_v48, %v1181_v20  ;;  %v2162_v23 = vpack.c.bf16 %v1345_v19, %v1344_v22  ;;  %v4481_v19 = vld [vmem:[#allocation56_spill] sm:$0xff] }
 0x16a   : > { %v2163_v24 = vpack.c.bf16 %v1347_v5, %v1346_v26  ;;  %v2164_v31 = vpack.c.bf16 %v1349_v7, %v1348_v45  ;;  %v4482_v7 = vld [vmem:[#allocation57_spill] sm:$0xff] }
 0x16b   : > { %v1094_v51 = vadd.f32 1e-06, %v1078_v61  ;;  %v2165_v32 = vpack.c.bf16 %v1351_v49, %v1350_v15  ;;  %1828 = vst [vmem:[%s3867_s5 + $0xe0] sm:$0xff] %v2162_v23  ;;  %v4475_v61 = vld [vmem:[#allocation50_spill] sm:$0xff] }
 0x16c   : > { %v2290_v35 = vpop.eup %2289  ;;  %1829 = vst [vmem:[%s3867_s5 + $0xe8] sm:$0xff] %v2163_v24  ;;  %1830 = vst [vmem:[%s3867_s5 + $0xf0] sm:$0xff] %v2164_v31  ;;  %v4483_v49 = vld [vmem:[#allocation58_spill] sm:$0xff]  ;;  %v4484_v24 = vld [vmem:[#allocation59_spill] sm:$0xff] }
 0x16d   : > { %2293 = vrsqrt.f32 %v1094_v51  ;;  %1831 = vst [vmem:[%s3867_s5 + $0xf8] sm:$0xff] %v2165_v32  ;;  %v1166_v11 = vmul.f32 %v2290_v35, %v4472_v58  ;;  %v1167_v41 = vmul.f32 %v2290_v35, %v4473_v13  ;;  %v1168_v59 = vmul.f32 %v2290_v35, %v4474_v44  ;;  %v4477_v51 = vld [vmem:[#allocation52_spill] sm:$0xff]  ;;  %v4487_v58 = vld [vmem:[#allocation62_spill] sm:$0xff] }
 0x16e   : > { %v1169_v47 = vmul.f32 %v2290_v35, %v4475_v61  ;;  %v1170_v50 = vmul.f32 %v2290_v35, %v4476_v46  ;;  %v1171_v52 = vmul.f32 %v2290_v35, %v4477_v51  ;;  %v1172_v55 = vmul.f32 %v2290_v35, %v4478_v54  ;;  %v4485_v31 = vld [vmem:[#allocation60_spill] sm:$0xff] }
 0x16f   : > { %v1173_v43 = vmul.f32 %v2290_v35, %v4479_v14  ;;  %v1336_v1 = vmul.f32 %v3832_v8, %v1166_v11  ;;  %v1337_v0 = vmul.f32 %v3834_v37, %v1167_v41  ;;  %v1338_v38 = vmul.f32 %v3836_v28, %v1168_v59 }
 0x170   : > { %v1339_v62 = vmul.f32 %v3838_v25, %v1169_v47  ;;  %v1340_v12 = vmul.f32 %v3840_v53, %v1170_v50  ;;  %v1341_v6 = vmul.f32 %v3842_v56, %v1171_v52  ;;  %v1342_v16 = vmul.f32 %v3844_v9, %v1172_v55  ;;  %v4488_v55 = vld [vmem:[#allocation63_spill] sm:$0xff] }
 0x171   : > { %v2292_v60 = vpop.eup %2291  ;;  %v1343_v17 = vmul.f32 %v3846_v48, %v1173_v43  ;;  %v2158_v18 = vpack.c.bf16 %v1337_v0, %v1336_v1  ;;  %v4489_v43 = vld [vmem:[#allocation64_spill] sm:$0xff] }
 0x172   : > { %v1032_v21 = vpop.xlane.xlu1 %1031  ;;  %v2159_v20 = vpack.c.bf16 %v1339_v62, %v1338_v38  ;;  %v1191_v26 = vmul.f32 %v2292_v60, %v4481_v19  ;;  %v2160_v5 = vpack.c.bf16 %v1341_v6, %v1340_v12  ;;  %v1192_v15 = vmul.f32 %v2292_v60, %v4482_v7  ;;  %v4490_v62 = vld [vmem:[#allocation65_spill] sm:$0xff]  ;;  %v4491_v6 = vld [vmem:[#allocation66_spill] sm:$0xff] }
 0x173   : > { %v1081_v30 = vmul.f32 0.0009765625, %v1032_v21  ;;  %v4480_v21 = vld [vmem:[#allocation55_spill] sm:$0xff]  ;;  %v2161_v45 = vpack.c.bf16 %v1343_v17, %v1342_v16  ;;  %v1193_v23 = vmul.f32 %v2292_v60, %v4483_v49  ;;  %1824 = vst [vmem:[%s3867_s5 + $0xc0] sm:$0xff] %v2158_v18  ;;  %v1195_v32 = vmul.f32 %v2292_v60, %v4485_v31 }
 0x174   : > { %v1190_v22 = vmul.f32 %v2292_v60, %v4480_v21  ;;  %1825 = vst [vmem:[%s3867_s5 + $0xc8] sm:$0xff] %v2159_v20  ;;  %v1197_v11 = vmul.f32 %v2292_v60, %v4487_v58  ;;  %1826 = vst [vmem:[%s3867_s5 + $0xd0] sm:$0xff] %v2160_v5  ;;  %v1361_v44 = vmul.f32 %v3834_v37, %v1191_v26  ;;  %v4492_v17 = vld [vmem:[#allocation67_spill] sm:$0xff]  ;;  %v4493_v20 = vld [vmem:[#allocation68_spill] sm:$0xff] }
 0x175   : > { %v3989_v36 = vadd.f32 1e-06, %v1081_v30  ;;  %v1194_v30 = vmul.f32 %v2292_v60, %v4484_v24  ;;  %1827 = vst [vmem:[%s3867_s5 + $0xd8] sm:$0xff] %v2161_v45  ;;  %v1362_v59 = vmul.f32 %v3836_v28, %v1192_v15  ;;  %v1363_v61 = vmul.f32 %v3838_v25, %v1193_v23  ;;  %v4495_v26 = vld [vmem:[#allocation70_spill] sm:$0xff] }
 0x176   : > { %v1360_v41 = vmul.f32 %v3832_v8, %v1190_v22  ;;  %v1365_v46 = vmul.f32 %v3842_v56, %v1195_v32  ;;  %v1367_v51 = vmul.f32 %v3846_v48, %v1197_v11  ;;  %v4494_v22 = vld [vmem:[#allocation69_spill] sm:$0xff] }
 0x177   : > { %v2294_v13 = vpop.eup %2293  ;;  %v1364_v47 = vmul.f32 %v3840_v53, %v1194_v30  ;;  %v2171_v54 = vpack.c.bf16 %v1363_v61, %v1362_v59  ;;  %2295 = vrsqrt.f32 %v3989_v36 }
 0x178   : > { %v2170_v52 = vpack.c.bf16 %v1361_v44, %v1360_v41  ;;  %v1182_v14 = vmul.f32 %v2294_v13, %v4488_v55  ;;  %v1184_v12 = vmul.f32 %v2294_v13, %v4490_v62  ;;  %v1185_v16 = vmul.f32 %v2294_v13, %v4491_v6 }
 0x179   : > { %v1023_v34 = vpop.xlane.xlu0 %1022  ;;  %v2172_v0 = vpack.c.bf16 %v1365_v46, %v1364_v47  ;;  %1837 = vst [vmem:[%s3867_s5 + $0x128] sm:$0xff] %v2171_v54  ;;  %v1186_v18 = vmul.f32 %v2294_v13, %v4492_v17  ;;  %v1187_v21 = vmul.f32 %v2294_v13, %v4493_v20  ;;  %v1188_v19 = vmul.f32 %v2294_v13, %v4494_v22  ;;  %v4496_v54 = vld [vmem:[#allocation71_spill] sm:$0xff] }
 0x17a   : > { %v3991_v2 = vmul.f32 0.0009765625, %v1023_v34  ;;  %v4486_v34 = vld [vmem:[#allocation61_spill] sm:$0xff]  ;;  %1836 = vst [vmem:[%s3867_s5 + $0x120] sm:$0xff] %v2170_v52  ;;  %v1189_v5 = vmul.f32 %v2294_v13, %v4495_v26  ;;  %v1352_v45 = vmul.f32 %v3832_v8, %v1182_v14  ;;  %v1354_v15 = vmul.f32 %v3836_v28, %v1184_v12  ;;  %v4497_v14 = vld [vmem:[#allocation72_spill] sm:$0xff]  ;;  %v4500_v12 = vld [vmem:[#allocation75_spill] sm:$0xff] }
 0x17b   : > { %v1196_v35 = vmul.f32 %v2292_v60, %v4486_v34  ;;  %v1183_v60 = vmul.f32 %v2294_v13, %v4489_v43  ;;  %1838 = vst [vmem:[%s3867_s5 + $0x130] sm:$0xff] %v2172_v0  ;;  %v1355_v49 = vmul.f32 %v3838_v25, %v1185_v16  ;;  %v1356_v24 = vmul.f32 %v3840_v53, %v1186_v18  ;;  %v4499_v0 = vld [vmem:[#allocation74_spill] sm:$0xff]  ;;  %v4501_v16 = vld [vmem:[#allocation76_spill] sm:$0xff]  ;;  %v4502_v18 = vld [vmem:[#allocation77_spill] sm:$0xff] }
 0x17c   : > { %v1357_v30 = vmul.f32 %v3842_v56, %v1187_v21  ;;  %v1358_v31 = vmul.f32 %v3844_v9, %v1188_v19  ;;  %v1359_v32 = vmul.f32 %v3846_v48, %v1189_v5  ;;  %v1096_v58 = vadd.f32 1e-06, %v3991_v2  ;;  %v4503_v21 = vld [vmem:[#allocation78_spill] sm:$0xff] }
 0x17d   : > { %v1366_v50 = vmul.f32 %v3844_v9, %v1196_v35  ;;  %v1353_v7 = vmul.f32 %v3834_v37, %v1183_v60  ;;  %v2167_v35 = vpack.c.bf16 %v1355_v49, %v1354_v15  ;;  %v4498_v60 = vld [vmem:[#allocation73_spill] sm:$0xff] }
 0x17e   : > { %v2168_v11 = vpack.c.bf16 %v1357_v30, %v1356_v24  ;;  %v2169_v13 = vpack.c.bf16 %v1359_v32, %v1358_v31  ;;  %2297 = vrsqrt.f32 %v1096_v58  ;;  %v4504_v31 = vld [vmem:[#allocation79_spill] sm:$0xff] }
 0x17f   : > { %v2173_v38 = vpack.c.bf16 %v1367_v51, %v1366_v50  ;;  %v2166_v34 = vpack.c.bf16 %v1353_v7, %v1352_v45  ;;  %1833 = vst [vmem:[%s3867_s5 + $0x108] sm:$0xff] %v2167_v35 }
 0x180   : > { %1834 = vst [vmem:[%s3867_s5 + $0x110] sm:$0xff] %v2168_v11  ;;  %1835 = vst [vmem:[%s3867_s5 + $0x118] sm:$0xff] %v2169_v13  ;;  %v4506_v13 = vld [vmem:[#allocation81_spill] sm:$0xff] }
 0x181   : > { %v1050_v1 = vpop.xlane.xlu1 %1049  ;;  %1839 = vst [vmem:[%s3867_s5 + $0x138] sm:$0xff] %v2173_v38  ;;  %1832 = vst [vmem:[%s3867_s5 + $0x100] sm:$0xff] %v2166_v34  ;;  %v2296_v36 = vpop.eup %2295  ;;  %v4505_v34 = vld [vmem:[#allocation80_spill] sm:$0xff] }
 0x182   : > { %v1083_v41 = vmul.f32 0.0009765625, %v1050_v1  ;;  %v1206_v55 = vmul.f32 %v2296_v36, %v4496_v54  ;;  %v1207_v43 = vmul.f32 %v2296_v36, %v4497_v14  ;;  %v1208_v1 = vmul.f32 %v2296_v36, %v4498_v60  ;;  %v4511_v54 = vld [vmem:[#allocation86_spill] sm:$0xff] }
 0x183   : > { %v1209_v38 = vmul.f32 %v2296_v36, %v4499_v0  ;;  %v1210_v6 = vmul.f32 %v2296_v36, %v4500_v12  ;;  %v1211_v17 = vmul.f32 %v2296_v36, %v4501_v16  ;;  %v1212_v20 = vmul.f32 %v2296_v36, %v4502_v18 }
 0x184   : > { %v1099_v47 = vadd.f32 1e-06, %v1083_v41  ;;  %v1213_v22 = vmul.f32 %v2296_v36, %v4503_v21  ;;  %v1376_v19 = vmul.f32 %v3832_v8, %v1206_v55  ;;  %v1377_v26 = vmul.f32 %v3834_v37, %v1207_v43 }
 0x185   : > { %v1378_v5 = vmul.f32 %v3836_v28, %v1208_v1  ;;  %v1379_v45 = vmul.f32 %v3838_v25, %v1209_v38  ;;  %v1380_v7 = vmul.f32 %v3840_v53, %v1210_v6  ;;  %v1381_v15 = vmul.f32 %v3842_v56, %v1211_v17 }
 0x186   : > { %v1041_v23 = vpop.xlane.xlu0 %1040  ;;  %2299 = vrsqrt.f32 %v1099_v47  ;;  %v1382_v49 = vmul.f32 %v3844_v9, %v1212_v20  ;;  %v2178_v24 = vpack.c.bf16 %v1377_v26, %v1376_v19  ;;  %v4508_v47 = vld [vmem:[#allocation83_spill] sm:$0xff] }
 0x187   : > { %v1082_v44 = vmul.f32 0.0009765625, %v1041_v23  ;;  %v1383_v23 = vmul.f32 %v3846_v48, %v1213_v22  ;;  %v2179_v30 = vpack.c.bf16 %v1379_v45, %v1378_v5  ;;  %v2180_v58 = vpack.c.bf16 %v1381_v15, %v1380_v7  ;;  %v4512_v20 = vld [vmem:[#allocation87_spill] sm:$0xff]  ;;  %v4513_v22 = vld [vmem:[#allocation88_spill] sm:$0xff]  ;;  %v4514_v45 = vld [vmem:[#allocation89_spill] sm:$0xff] }
 0x188   : > { %v2298_v62 = vpop.eup %2297  ;;  %1844 = vst [vmem:[%s3867_s5 + $0x160] sm:$0xff] %v2178_v24  ;;  %v4515_v15 = vld [vmem:[#allocation90_spill] sm:$0xff] }
 0x189   : > { %v1098_v46 = vadd.f32 1e-06, %v1082_v44  ;;  %v1198_v32 = vmul.f32 %v2298_v62, %v4504_v31  ;;  %v1199_v35 = vmul.f32 %v2298_v62, %v4505_v34  ;;  %v2181_v11 = vpack.c.bf16 %v1383_v23, %v1382_v49  ;;  %v4507_v44 = vld [vmem:[#allocation82_spill] sm:$0xff]  ;;  %1845 = vst [vmem:[%s3867_s5 + $0x168] sm:$0xff] %v2179_v30  ;;  %1846 = vst [vmem:[%s3867_s5 + $0x170] sm:$0xff] %v2180_v58  ;;  %v4516_v23 = vld [vmem:[#allocation91_spill] sm:$0xff] }
 0x18a   : > { %v1200_v41 = vmul.f32 %v2298_v62, %v4506_v13  ;;  %v1205_v55 = vmul.f32 %v2298_v62, %v4511_v54  ;;  %v4517_v30 = vld [vmem:[#allocation92_spill] sm:$0xff] }
 0x18b   : > { %2301 = vrsqrt.f32 %v1098_v46  ;;  %v1202_v46 = vmul.f32 %v2298_v62, %v4508_v47  ;;  %1847 = vst [vmem:[%s3867_s5 + $0x178] sm:$0xff] %v2181_v11  ;;  %v1368_v14 = vmul.f32 %v3832_v8, %v1198_v32  ;;  %v1369_v43 = vmul.f32 %v3834_v37, %v1199_v35  ;;  %v4518_v32 = vld [vmem:[#allocation93_spill] sm:$0xff]  ;;  %v4519_v35 = vld [vmem:[#allocation94_spill] sm:$0xff]  ;;  %v4521_v54 = vld [vmem:[#allocation96_spill] sm:$0xff] }
 0x18c   : > { %v1370_v60 = vmul.f32 %v3836_v28, %v1200_v41 }
 0x18d   : > { %v1068_v59 = vpop.xlane.xlu1 %1067  ;;  %v1372_v38 = vmul.f32 %v3840_v53, %v1202_v46  ;;  %v2174_v17 = vpack.c.bf16 %v1369_v43, %v1368_v14 }
 0x18e   : > { %v1085_v61 = vmul.f32 0.0009765625, %v1068_v59  ;;  %v1201_v59 = vmul.f32 %v2298_v62, %v4507_v44 }
 0x18f   : > { %1840 = vst [vmem:[%s3867_s5 + $0x140] sm:$0xff] %v2174_v17  ;;  %v4525_v17 = vld [vmem:[#allocation100_spill] sm:$0xff] }
 0x190   : > { %v1101_v50 = vadd.f32 1e-06, %v1085_v61  ;;  %v2300_v61 = vpop.eup %2299  ;;  %v1371_v1 = vmul.f32 %v3838_v25, %v1201_v59 }
 0x191   : > { %v1222_v21 = vmul.f32 %v2300_v61, %v4512_v20  ;;  %v1223_v19 = vmul.f32 %v2300_v61, %v4513_v22  ;;  %v1224_v7 = vmul.f32 %v2300_v61, %v4514_v45  ;;  %v1225_v49 = vmul.f32 %v2300_v61, %v4515_v15 }
 0x192   : > { %2303 = vrsqrt.f32 %v1101_v50  ;;  %v4509_v50 = vld [vmem:[#allocation84_spill] sm:$0xff]  ;;  %v2175_v18 = vpack.c.bf16 %v1371_v1, %v1370_v60  ;;  %v1226_v24 = vmul.f32 %v2300_v61, %v4516_v23  ;;  %v1227_v31 = vmul.f32 %v2300_v61, %v4517_v30  ;;  %v4522_v60 = vld [vmem:[#allocation97_spill] sm:$0xff] }
 0x193   : > { %v1059_v51 = vpop.xlane.xlu0 %1058  ;;  %v1228_v34 = vmul.f32 %v2300_v61, %v4518_v32  ;;  %v1229_v58 = vmul.f32 %v2300_v61, %v4519_v35  ;;  %v1392_v11 = vmul.f32 %v3832_v8, %v1222_v21  ;;  %v1393_v13 = vmul.f32 %v3834_v37, %v1223_v19  ;;  %v4526_v21 = vld [vmem:[#allocation101_spill] sm:$0xff] }
 0x194   : > { %v1084_v52 = vmul.f32 0.0009765625, %v1059_v51  ;;  %v1203_v51 = vmul.f32 %v2298_v62, %v4509_v50  ;;  %1841 = vst [vmem:[%s3867_s5 + $0x148] sm:$0xff] %v2175_v18  ;;  %v1394_v41 = vmul.f32 %v3836_v28, %v1224_v7  ;;  %v1395_v44 = vmul.f32 %v3838_v25, %v1225_v49 }
 0x195   : > { %v2302_v0 = vpop.eup %2301  ;;  %v1396_v59 = vmul.f32 %v3840_v53, %v1226_v24  ;;  %v1397_v47 = vmul.f32 %v3842_v56, %v1227_v31  ;;  %v1398_v46 = vmul.f32 %v3844_v9, %v1228_v34  ;;  %v1399_v61 = vmul.f32 %v3846_v48, %v1229_v58  ;;  %v4527_v24 = vld [vmem:[#allocation102_spill] sm:$0xff]  ;;  %v4528_v31 = vld [vmem:[#allocation103_spill] sm:$0xff]  ;;  %v4529_v58 = vld [vmem:[#allocation104_spill] sm:$0xff] }
 0x196   : > { %v4057_v2 = vadd.f32 1e-06, %v1084_v52  ;;  %v4510_v52 = vld [vmem:[#allocation85_spill] sm:$0xff]  ;;  %v1373_v12 = vmul.f32 %v3842_v56, %v1203_v51  ;;  %v2186_v50 = vpack.c.bf16 %v1393_v13, %v1392_v11  ;;  %v2187_v51 = vpack.c.bf16 %v1395_v44, %v1394_v41  ;;  %v4531_v44 = vld [vmem:[#allocation106_spill] sm:$0xff] }
 0x197   : > { %v1204_v36 = vmul.f32 %v2298_v62, %v4510_v52  ;;  %v1375_v62 = vmul.f32 %v3846_v48, %v1205_v55  ;;  %v4520_v52 = vld [vmem:[#allocation95_spill] sm:$0xff]  ;;  %v1215_v55 = vmul.f32 %v2302_v0, %v4521_v54  ;;  %v2188_v14 = vpack.c.bf16 %v1397_v47, %v1396_v59  ;;  %v4530_v13 = vld [vmem:[#allocation105_spill] sm:$0xff] }
 0x198   : > { %v2176_v26 = vpack.c.bf16 %v1373_v12, %v1372_v38  ;;  %v2189_v43 = vpack.c.bf16 %v1399_v61, %v1398_v46  ;;  %v1216_v1 = vmul.f32 %v2302_v0, %v4522_v60  ;;  %v4523_v38 = vld [vmem:[#allocation98_spill] sm:$0xff]  ;;  %1852 = vst [vmem:[%s3867_s5 + $0x1a0] sm:$0xff] %v2186_v50  ;;  %1853 = vst [vmem:[%s3867_s5 + $0x1a8] sm:$0xff] %v2187_v51  ;;  %v4532_v47 = vld [vmem:[#allocation107_spill] sm:$0xff]  ;;  %2305 = vrsqrt.f32 %v4057_v2 }
 0x199   : > { %v1374_v6 = vmul.f32 %v3844_v9, %v1204_v36  ;;  %v1214_v36 = vmul.f32 %v2302_v0, %v4520_v52  ;;  %v1217_v12 = vmul.f32 %v2302_v0, %v4523_v38  ;;  %v1219_v18 = vmul.f32 %v2302_v0, %v4525_v17  ;;  %1854 = vst [vmem:[%s3867_s5 + $0x1b0] sm:$0xff] %v2188_v14 }
 0x19a   : > { %1842 = vst [vmem:[%s3867_s5 + $0x150] sm:$0xff] %v2176_v26  ;;  %v1220_v20 = vmul.f32 %v2302_v0, %v3629_v57  ;;  %v1221_v22 = vmul.f32 %v2302_v0, %v4526_v21  ;;  %1855 = vst [vmem:[%s3867_s5 + $0x1b8] sm:$0xff] %v2189_v43  ;;  %v1385_v26 = vmul.f32 %v3834_v37, %v1215_v55 }
 0x19b   : > { %v2177_v5 = vpack.c.bf16 %v1375_v62, %v1374_v6  ;;  %v4524_v6 = vld [vmem:[#allocation99_spill] sm:$0xff]  ;;  %v1384_v19 = vmul.f32 %v3832_v8, %v1214_v36  ;;  %v1387_v45 = vmul.f32 %v3838_v25, %v1217_v12  ;;  %v1389_v15 = vmul.f32 %v3842_v56, %v1219_v18 }
 0x19c   : > { %v2304_v16 = vpop.eup %2303  ;;  %v1218_v62 = vmul.f32 %v2302_v0, %v4524_v6  ;;  %v1390_v57 = vmul.f32 %v3844_v9, %v1220_v20  ;;  %v1391_v0 = vmul.f32 %v3846_v48, %v1221_v22 }
 0x19d   : > { %1843 = vst [vmem:[%s3867_s5 + $0x158] sm:$0xff] %v2177_v5  ;;  %v1386_v5 = vmul.f32 %v3836_v28, %v1216_v1  ;;  %v2182_v49 = vpack.c.bf16 %v1385_v26, %v1384_v19  ;;  %v1238_v30 = vmul.f32 %v2304_v16, %v4527_v24  ;;  %v1239_v32 = vmul.f32 %v2304_v16, %v4528_v31 }
 0x19e   : > { %v1388_v7 = vmul.f32 %v3840_v53, %v1218_v62  ;;  %v2185_v35 = vpack.c.bf16 %v1391_v0, %v1390_v57  ;;  %v1240_v11 = vmul.f32 %v2304_v16, %v4529_v58  ;;  %v1241_v41 = vmul.f32 %v2304_v16, %v4530_v13 }
 0x19f   : > { %v2183_v23 = vpack.c.bf16 %v1387_v45, %v1386_v5  ;;  %1848 = vst [vmem:[%s3867_s5 + $0x180] sm:$0xff] %v2182_v49  ;;  %v1242_v59 = vmul.f32 %v2304_v16, %v4531_v44  ;;  %v1243_v46 = vmul.f32 %v2304_v16, %v4532_v47  ;;  %v1244_v61 = vmul.f32 %v2304_v16, %v3696_v3 }
 0x1a0   : > { %v2184_v34 = vpack.c.bf16 %v1389_v15, %v1388_v7  ;;  %v1245_v50 = vmul.f32 %v2304_v16, %v3698_v4  ;;  %1851 = vst [vmem:[%s3867_s5 + $0x198] sm:$0xff] %v2185_v35  ;;  %v1408_v51 = vmul.f32 %v3832_v8, %v1238_v30  ;;  %v1409_v52 = vmul.f32 %v3834_v37, %v1239_v32 }
 0x1a1   : > { %1849 = vst [vmem:[%s3867_s5 + $0x188] sm:$0xff] %v2183_v23  ;;  %v1410_v36 = vmul.f32 %v3836_v28, %v1240_v11  ;;  %v1411_v54 = vmul.f32 %v3838_v25, %v1241_v41  ;;  %v1412_v55 = vmul.f32 %v3840_v53, %v1242_v59  ;;  %v1413_v3 = vmul.f32 %v3842_v56, %v1243_v46 }
 0x1a2   : > { %1850 = vst [vmem:[%s3867_s5 + $0x190] sm:$0xff] %v2184_v34  ;;  %v1414_v4 = vmul.f32 %v3844_v9, %v1244_v61  ;;  %v1415_v16 = vmul.f32 %v3846_v48, %v1245_v50  ;;  %v2194_v14 = vpack.c.bf16 %v1409_v52, %v1408_v51  ;;  %v2306_v38 = vpop.eup %2305 }
 0x1a3   : > { %v2195_v43 = vpack.c.bf16 %v1411_v54, %v1410_v36  ;;  %v2196_v60 = vpack.c.bf16 %v1413_v3, %v1412_v55  ;;  %v1230_v12 = vmul.f32 %v2306_v38, %v3747_v27  ;;  %v1231_v6 = vmul.f32 %v2306_v38, %v3749_v33 }
 0x1a4   : > { %v2197_v1 = vpack.c.bf16 %v1415_v16, %v1414_v4  ;;  %1860 = vst [vmem:[%s3867_s5 + $0x1e0] sm:$0xff] %v2194_v14  ;;  %v1232_v62 = vmul.f32 %v2306_v38, %v3751_v29  ;;  %v1233_v17 = vmul.f32 %v2306_v38, %v3753_v10  ;;  %v1234_v18 = vmul.f32 %v2306_v38, %v3755_v39 }
 0x1a5   : > { %1861 = vst [vmem:[%s3867_s5 + $0x1e8] sm:$0xff] %v2195_v43  ;;  %1862 = vst [vmem:[%s3867_s5 + $0x1f0] sm:$0xff] %v2196_v60  ;;  %v1235_v2 = vmul.f32 %v2306_v38, %v3757_v40  ;;  %v1236_v20 = vmul.f32 %v2306_v38, %v3759_v63  ;;  %v1237_v21 = vmul.f32 %v2306_v38, %v3761_v42 }
 0x1a6   : > { %1863 = vst [vmem:[%s3867_s5 + $0x1f8] sm:$0xff] %v2197_v1  ;;  %v1400_v27 = vmul.f32 %v3832_v8, %v1230_v12  ;;  %v1401_v33 = vmul.f32 %v3834_v37, %v1231_v6  ;;  %v1402_v10 = vmul.f32 %v3836_v28, %v1232_v62  ;;  %v1403_v29 = vmul.f32 %v3838_v25, %v1233_v17 }
 0x1a7   : > { %v1404_v39 = vmul.f32 %v3840_v53, %v1234_v18  ;;  %v1405_v40 = vmul.f32 %v3842_v56, %v1235_v2  ;;  %v1406_v63 = vmul.f32 %v3844_v9, %v1236_v20  ;;  %v1407_v42 = vmul.f32 %v3846_v48, %v1237_v21 }
 0x1a8   : > { %v2190_v22 = vpack.c.bf16 %v1401_v33, %v1400_v27  ;;  %v2191_v8 = vpack.c.bf16 %v1403_v29, %v1402_v10 }
 0x1a9   : > { %v2192_v37 = vpack.c.bf16 %v1405_v40, %v1404_v39  ;;  %v2193_v28 = vpack.c.bf16 %v1407_v42, %v1406_v63 }
 0x1aa   : > { %1856 = vst [vmem:[%s3867_s5 + $0x1c0] sm:$0xff] %v2190_v22  ;;  %1857 = vst [vmem:[%s3867_s5 + $0x1c8] sm:$0xff] %v2191_v8 }
 0x1ab   : > { %1858 = vst [vmem:[%s3867_s5 + $0x1d0] sm:$0xff] %v2192_v37  ;;  %1859 = vst [vmem:[%s3867_s5 + $0x1d8] sm:$0xff] %v2193_v28 }
 0x1ac   : > { %2436 = shalt.err (!%p2433_p12)
}
 0x1ad   : > { %s2437_s10 = scalar_lea.hbm %s4181_s9, 8192  ;;  %s2441_s23 = scalar_lea.hbm %s4234_s3, 16384 }
 0x1ae   : > { %p2438_p9 = scmp.ne.s32.totalorder %s4181_s9, %s2437_s10  ;;  %p2442_p5 = scmp.lt.u32.totalorder %s4181_s9, %s4234_s3 }
 0x1af   : > { %p2443_p6 = scmp.lt.u32.totalorder %s2441_s23, %s2437_s10  ;;  %p2445_p7 = scmp.lt.u32.totalorder %s2437_s10, %s4181_s9 }
 0x1b0   : > { %p2439_p11 = pnand %p2438_p9, %p4440_p0 }
 0x1b1   : > { %p2444_p13 = por %p2443_p6, %p2442_p5 }
 0x1b2   : > { %p2440_p4 = pneg %p2439_p11 }
 0x1b3   : > { %p2446_p3 = por %p2445_p7, %p2444_p13 }
 0x1b5   : > { %p2447_p1 = pnand %p2446_p3, %p2440_p4 }
 0x1b7   : > { %2450 = shalt.err (!%p2447_p1)
}
 0x1b8   : > { %s2512_s13 = smov 512   ;;  %s2513_s5 = smov 32  }
 0x1b9   : > { %2210 = dma.vmem_to_hbm [thread:$0]  (%p4440_p0), %s4183_s6, 8192, %s4181_s9, %s1865_s30, %s2512_s13, %s2512_s13, %s2513_s5  }
 0x1ba PF: > { %s1916_s20 = sand.u32 1, %s2489_s15   ;;  %p4533_p8 = scmp.ne.s32.totalorder %s4337_s28, 0 }
 0x1bb   : > { %p4534_p10 = scmp.ge.s32.totalorder %s2501_s18, 2  ;;  %s1917_s19 = scalar_lea.sflag [#allocation4], %s1916_s20 }
 0x1bd   : > { %p2226_p2 = pnand %p4534_p10, %p4533_p8 }
 0x1bf   : > { %2480 = dma.done.wait (!%p2226_p2), %s1917_s19, 8192  }
 0x1c0   : > { %2482 = vsyncadd (!%p2226_p2), %s1917_s19, 4294959104  ;;  %s1926_s25 = scalar_lea.sflag [#allocation10], %s1916_s20 }
 0x1c1   : > { %2484 = dma.done.wait (!%p2226_p2), %s1926_s25, 16384  }
 0x1c2   : > { %2486 = vsyncadd (!%p2226_p2), %s1926_s25, 4294950912  ;;  %p24_p0 = scmp.ge.s32.totalorder %s2564_s21, 4   ;;  %s4535_s15 = smov %s2493_s16 }
 0x1c3   : > { %s4536_s16 = smov %s2497_s17  ;;  %s4537_s17 = smov %s2576_s24 }
 0x1c4   : > { %s4538_s18 = smov %s2564_s21  ;;  %26 = sbr.rel (!%p24_p0) target bundleno = 11 (0xb), region = 111 }
 0x1cb   :  { %1931 = vsyncpa [#allocation3], 1 }
 0x1cc   :  { %1933 = vsyncpa [#allocation3 + $0x1], 1 }
 0x1cd   :  { %1934 = vsyncpa [#allocation6], 1 }
 0x1ce   :  { %1936 = vsyncpa [#allocation6 + $0x1], 1 }
 0x1cf   :  { %1937 = vsyncpa [#allocation4], 1 }
 0x1d0   :  { %1939 = vsyncpa [#allocation4 + $0x1], 1 }
 0x1d1   :  { %1940 = vsyncpa [#allocation10], 1 }
 0x1d2   :  { %1942 = vsyncpa [#allocation10 + $0x1], 1 }

</bundles_post_ra>
